<compile_context>
chip_gen: v7x
topology: tpu7x:2x2x1
jax: 0.10.0
libtpu: 0.0.40
codegen_flags: <defaults>
</compile_context>

<pallas_src>
import functools

import jax
import jax.numpy as jnp
from jax.experimental import pallas as pl
from jax.experimental.pallas import tpu as pltpu

INV_TEMPERATURE = 10.0   # 1 / 0.1 (info_nce default temperature)
_NEG_BIG = -1e30


def _infonce_kernel(emb_row_ref, emb_col_ref, pos_ref, rlab_ref, clab_ref,
                    out_ref,
                    en_row_scr, pos_scr, m_scr, l_scr,
                    *, n_valid, block_m, block_n, matmul_dtype):
    i = pl.program_id(0)
    j = pl.program_id(1)

    @pl.when(j == 0)
    def _init():
        e = emb_row_ref[...]                                     # (TM, D)
        sq = jnp.sum(e * e, axis=1, keepdims=True)
        en = e * jax.lax.rsqrt(jnp.maximum(sq, 1e-24))           # == x / max(||x||, 1e-12)
        en_row_scr[...] = en

        p = pos_ref[...]                                         # (TM, D)
        psq = jnp.sum(p * p, axis=1, keepdims=True)
        pn = p * jax.lax.rsqrt(jnp.maximum(psq, 1e-24))
        pos_logit = jnp.sum(en * pn, axis=1, keepdims=True) * INV_TEMPERATURE

        pos_scr[...] = pos_logit
        m_scr[...] = pos_logit                                   # pos term always in the LSE
        l_scr[...] = jnp.ones_like(l_scr)                        # exp(pos - m) = 1

    en_row = en_row_scr[...]

    ec = emb_col_ref[...]                                        # (TN, D)
    csq = jnp.sum(ec * ec, axis=1, keepdims=True)
    en_col = ec * jax.lax.rsqrt(jnp.maximum(csq, 1e-24))

    # (TM, TN) similarity tile, transpose-free: contract feature dim of both.
    logits = jax.lax.dot_general(
        en_row.astype(matmul_dtype), en_col.astype(matmul_dtype),
        dimension_numbers=(((1,), (1,)), ((), ())),
        preferred_element_type=jnp.float32) * INV_TEMPERATURE

    col_ids = jax.lax.broadcasted_iota(jnp.int32, (1, block_n), 1) + j * block_n
    neg_mask = (clab_ref[...] != rlab_ref[...]) & (col_ids < n_valid)   # (TM, TN)

    m_prev = m_scr[...]
    blk_max = jnp.max(jnp.where(neg_mask, logits, _NEG_BIG), axis=1, keepdims=True)
    m_new = jnp.maximum(m_prev, blk_max)

    # Exponentiate once, mask after (one EUP pass; no exp of sentinel values).
    p_exp = jnp.exp(logits - m_new)
    p_exp = jnp.where(neg_mask, p_exp, 0.0)

    l_scr[...] = l_scr[...] * jnp.exp(m_prev - m_new) + jnp.sum(p_exp, axis=1, keepdims=True)
    m_scr[...] = m_new

    @pl.when(j == pl.num_programs(1) - 1)
    def _finalize():
        loss = m_scr[...] + jnp.log(l_scr[...]) - pos_scr[...]   # (TM, 1)
        row_ids = jax.lax.broadcasted_iota(jnp.int32, (block_m, 1), 0) + i * block_m
        out_ref[...] = jnp.where(row_ids < n_valid, loss, 0.0)


def _round_up(x, m):
    return (x + m - 1) // m * m


def infonce_loss_pallas(embeddings, labels, pos_idx, *, matmul_dtype=jnp.float32):
    """embeddings (N,D) f32, labels (N,1)/(N,) int, pos_idx (N,) int -> scalar f32 loss.

    matmul_dtype=jnp.bfloat16 is recommended on v6e/v7x for MXU throughput
    (logits differ at ~1e-2 relative; normalization / LSE stay in f32).
    """
    embeddings = embeddings.astype(jnp.float32)
    n, d = embeddings.shape
    lab = labels.reshape(-1).astype(jnp.int32)

    # Tile size: 128 for tiny problems, 256 otherwise (fills v6e/v7x 256x256
    # MXU, still 128-aligned for v5e).  One tile size for rows and cols keeps
    # the padded extent trivially divisible.
    t = min(256, _round_up(n, 128))
    n_pad = _round_up(n, t)
    d_pad = _round_up(d, 128)

    emb_pad = jnp.zeros((n_pad, d_pad), jnp.float32).at[:n, :d].set(embeddings)
    pos_emb = embeddings[pos_idx.astype(jnp.int32)]              # glue gather, O(N*D)
    pos_pad = jnp.zeros((n_pad, d_pad), jnp.float32).at[:n, :d].set(pos_emb)
    rlab = jnp.full((n_pad, 1), -1, jnp.int32).at[:n, 0].set(lab)
    clab = jnp.full((1, n_pad), -1, jnp.int32).at[0, :n].set(lab)

    grid = (n_pad // t, n_pad // t)
    kernel = functools.partial(
        _infonce_kernel, n_valid=n, block_m=t, block_n=t, matmul_dtype=matmul_dtype)

    losses = pl.pallas_call(
        kernel,
        out_shape=jax.ShapeDtypeStruct((n_pad, 1), jnp.float32),
        grid_spec=pltpu.PrefetchScalarGridSpec(
            num_scalar_prefetch=0,
            grid=grid,
            in_specs=[
                pl.BlockSpec((t, d_pad), lambda i, j: (i, 0)),   # anchor (row) block
                pl.BlockSpec((t, d_pad), lambda i, j: (j, 0)),   # candidate (col) block
                pl.BlockSpec((t, d_pad), lambda i, j: (i, 0)),   # gathered positives
                pl.BlockSpec((t, 1),     lambda i, j: (i, 0)),   # row labels
                pl.BlockSpec((1, t),     lambda i, j: (0, j)),   # col labels (pre-transposed)
            ],
            out_specs=pl.BlockSpec((t, 1), lambda i, j: (i, 0)),
            scratch_shapes=[
                pltpu.VMEM((t, d_pad), jnp.float32),             # normalized row block
                pltpu.VMEM((t, 1), jnp.float32),                 # positive logit
                pltpu.VMEM((t, 1), jnp.float32),                 # running max
                pltpu.VMEM((t, 1), jnp.float32),                 # running sum of exp
            ],
        ),
        compiler_params=pltpu.CompilerParams(
            dimension_semantics=("parallel", "arbitrary"),
        ),
    )(emb_pad, emb_pad, pos_pad, rlab, clab)

    return jnp.sum(losses) / n


def choose_positives(labels, key):
    """Deterministic stand-in for `torch.randint` positive sampling (glue).

    Returns (N,) int32 positive index per anchor (same label, different row).
    """
    n = labels.shape[0]
    lab = labels.reshape(-1)
    same = (lab[:, None] == lab[None, :]) & (~jnp.eye(n, dtype=bool))
    keys = jax.random.split(key, n)

    def pick(row_mask, k):
        scores = jnp.where(row_mask, jax.random.uniform(k, (n,)), -1.0)
        return jnp.argmax(scores)

    return jax.vmap(pick)(same, keys).astype(jnp.int32)


def infonce_loss_ref(embeddings, labels, pos_idx):
    """Pure-JAX reference for correctness checking."""
    n = embeddings.shape[0]
    en = embeddings / jnp.maximum(
        jnp.linalg.norm(embeddings, axis=1, keepdims=True), 1e-12)
    logits = (en @ en.T) * INV_TEMPERATURE
    pos_logit = logits[jnp.arange(n), pos_idx][:, None]
    lab = labels.reshape(n, 1)
    neg_mask = lab != lab.T
    neg_logits = jnp.where(neg_mask, logits, _NEG_BIG)
    m = jnp.maximum(pos_logit, jnp.max(neg_logits, axis=1, keepdims=True))
    lse = m + jnp.log(
        jnp.exp(pos_logit - m)
        + jnp.sum(jnp.where(neg_mask, jnp.exp(neg_logits - m), 0.0),
                  axis=1, keepdims=True))
    return jnp.mean(lse - pos_logit)


if __name__ == "__main__":
    key = jax.random.PRNGKey(0)
    k_emb, k_pos = jax.random.split(key)

    N, D = 8, 32  # n_samples, embedding_size
    embeddings = jax.random.normal(k_emb, (N, D), dtype=jnp.float32)
    # two classes, 4 samples each -> every anchor has positives and negatives
    labels = jnp.array([0, 0, 0, 0, 1, 1, 1, 1], dtype=jnp.int32).reshape(N, 1)

    pos_idx = choose_positives(labels, k_pos)

    loss = infonce_loss_pallas(embeddings, labels, pos_idx)
    jax.block_until_ready(loss)

    ref = infonce_loss_ref(embeddings, labels, pos_idx)
    assert jnp.allclose(loss, ref, rtol=1e-4, atol=1e-4), (loss, ref)

    print("KERNEL_OK")
</pallas_src>

<mosaic_0001>
module attributes {stable_mosaic.version = 11 : i64} {
  func.func @_infonce_kernel(%arg0: i32, %arg1: i32, %arg2: memref<128x128xf32, #tpu.memory_space<vmem>>, %arg3: memref<128x128xf32, #tpu.memory_space<vmem>>, %arg4: memref<128x128xf32, #tpu.memory_space<vmem>>, %arg5: memref<128x1xi32, #tpu.memory_space<vmem>>, %arg6: memref<1x128xi32, #tpu.memory_space<vmem>>, %arg7: memref<128x1xf32, #tpu.memory_space<vmem>>, %arg8: memref<128x128xf32, #tpu.memory_space<vmem>>, %arg9: memref<128x1xf32, #tpu.memory_space<vmem>>, %arg10: memref<128x1xf32, #tpu.memory_space<vmem>>, %arg11: memref<128x1xf32, #tpu.memory_space<vmem>>) attributes {dimension_semantics = [#tpu.dimension_semantics<parallel>, #tpu.dimension_semantics<arbitrary>], iteration_bounds = array<i64: 1, 1>, scalar_prefetch = 0 : i64, scratch_operands = 4 : i64, tpu.core_type = #tpu.core_type<tc>, window_params = [{transform_indices = @transform_0, window_bounds = array<i64: 128, 128>}, {transform_indices = @transform_1, window_bounds = array<i64: 128, 128>}, {transform_indices = @transform_2, window_bounds = array<i64: 128, 128>}, {transform_indices = @transform_3, window_bounds = array<i64: 128, 1>}, {transform_indices = @transform_4, window_bounds = array<i64: 1, 128>}, {transform_indices = @transform_5, window_bounds = array<i64: 128, 1>}]} {
    %c0_i32 = arith.constant 0 : i32
    %0 = arith.cmpi eq, %arg1, %c0_i32 : i32
    %1 = arith.extui %0 : i1 to i32
    %c0_i32_0 = arith.constant 0 : i32
    %2 = arith.cmpi ne, %1, %c0_i32_0 : i32
    scf.if %2 {
      %c0_25 = arith.constant 0 : index
      %c0_26 = arith.constant 0 : index
      %52 = vector.load %arg2[%c0_25, %c0_26] : memref<128x128xf32, #tpu.memory_space<vmem>>, vector<128x128xf32>
      %53 = arith.mulf %52, %52 : vector<128x128xf32>
      %cst_27 = arith.constant dense<0.000000e+00> : vector<128xf32>
      %54 = vector.multi_reduction <add>, %53, %cst_27 [1] : vector<128x128xf32> to vector<128xf32>
      %55 = vector.shape_cast %54 : vector<128xf32> to vector<128x1xf32>
      %cst_28 = arith.constant 1.000000e-24 : f32
      %56 = vector.broadcast %cst_28 : f32 to vector<128x1xf32>
      %57 = arith.maximumf %55, %56 : vector<128x1xf32>
      %58 = math.rsqrt %57 : vector<128x1xf32>
      %59 = vector.broadcast %58 : vector<128x1xf32> to vector<128x128xf32>
      %60 = arith.mulf %52, %59 : vector<128x128xf32>
      %c0_29 = arith.constant 0 : index
      %c0_30 = arith.constant 0 : index
      %61 = vector.load %arg8[%c0_29, %c0_30] : memref<128x128xf32, #tpu.memory_space<vmem>>, vector<128x128xf32>
      tpu.vector_store %arg8[%c0_29, %c0_30], %60 {strides = array<i32>} : memref<128x128xf32, #tpu.memory_space<vmem>>, vector<128x128xf32>,
      %c0_31 = arith.constant 0 : index
      %c0_32 = arith.constant 0 : index
      %62 = vector.load %arg4[%c0_31, %c0_32] : memref<128x128xf32, #tpu.memory_space<vmem>>, vector<128x128xf32>
      %63 = arith.mulf %62, %62 : vector<128x128xf32>
      %cst_33 = arith.constant dense<0.000000e+00> : vector<128xf32>
      %64 = vector.multi_reduction <add>, %63, %cst_33 [1] : vector<128x128xf32> to vector<128xf32>
      %65 = vector.shape_cast %64 : vector<128xf32> to vector<128x1xf32>
      %cst_34 = arith.constant 1.000000e-24 : f32
      %66 = vector.broadcast %cst_34 : f32 to vector<128x1xf32>
      %67 = arith.maximumf %65, %66 : vector<128x1xf32>
      %68 = math.rsqrt %67 : vector<128x1xf32>
      %69 = vector.broadcast %68 : vector<128x1xf32> to vector<128x128xf32>
      %70 = arith.mulf %62, %69 : vector<128x128xf32>
      %71 = arith.mulf %60, %70 : vector<128x128xf32>
      %cst_35 = arith.constant dense<0.000000e+00> : vector<128xf32>
      %72 = vector.multi_reduction <add>, %71, %cst_35 [1] : vector<128x128xf32> to vector<128xf32>
      %73 = vector.shape_cast %72 : vector<128xf32> to vector<128x1xf32>
      %cst_36 = arith.constant 1.000000e+01 : f32
      %74 = vector.broadcast %cst_36 : f32 to vector<128x1xf32>
      %75 = arith.mulf %73, %74 : vector<128x1xf32>
      %c0_37 = arith.constant 0 : index
      %c0_38 = arith.constant 0 : index
      %76 = vector.load %arg9[%c0_37, %c0_38] : memref<128x1xf32, #tpu.memory_space<vmem>>, vector<128x1xf32>
      tpu.vector_store %arg9[%c0_37, %c0_38], %75 {strides = array<i32>} : memref<128x1xf32, #tpu.memory_space<vmem>>, vector<128x1xf32>,
      %c0_39 = arith.constant 0 : index
      %c0_40 = arith.constant 0 : index
      %77 = vector.load %arg10[%c0_39, %c0_40] : memref<128x1xf32, #tpu.memory_space<vmem>>, vector<128x1xf32>
      tpu.vector_store %arg10[%c0_39, %c0_40], %75 {strides = array<i32>} : memref<128x1xf32, #tpu.memory_space<vmem>>, vector<128x1xf32>,
      %cst_41 = arith.constant 1.000000e+00 : f32
      %78 = vector.broadcast %cst_41 : f32 to vector<128x1xf32>
      %c0_42 = arith.constant 0 : index
      %c0_43 = arith.constant 0 : index
      %79 = vector.load %arg11[%c0_42, %c0_43] : memref<128x1xf32, #tpu.memory_space<vmem>>, vector<128x1xf32>
      tpu.vector_store %arg11[%c0_42, %c0_43], %78 {strides = array<i32>} : memref<128x1xf32, #tpu.memory_space<vmem>>, vector<128x1xf32>,
    } else {
    }
    %c0 = arith.constant 0 : index
    %c0_1 = arith.constant 0 : index
    %3 = vector.load %arg8[%c0, %c0_1] : memref<128x128xf32, #tpu.memory_space<vmem>>, vector<128x128xf32>
    %c0_2 = arith.constant 0 : index
    %c0_3 = arith.constant 0 : index
    %4 = vector.load %arg3[%c0_2, %c0_3] : memref<128x128xf32, #tpu.memory_space<vmem>>, vector<128x128xf32>
    %5 = arith.mulf %4, %4 : vector<128x128xf32>
    %cst = arith.constant dense<0.000000e+00> : vector<128xf32>
    %6 = vector.multi_reduction <add>, %5, %cst [1] : vector<128x128xf32> to vector<128xf32>
    %7 = vector.shape_cast %6 : vector<128xf32> to vector<128x1xf32>
    %cst_4 = arith.constant 1.000000e-24 : f32
    %8 = vector.broadcast %cst_4 : f32 to vector<128x1xf32>
    %9 = arith.maximumf %7, %8 : vector<128x1xf32>
    %10 = math.rsqrt %9 : vector<128x1xf32>
    %11 = vector.broadcast %10 : vector<128x1xf32> to vector<128x128xf32>
    %12 = arith.mulf %4, %11 : vector<128x128xf32>
    %cst_5 = arith.constant dense<0.000000e+00> : vector<128x128xf32>
    %13 = tpu.matmul %3, %12, %cst_5 {dimension_numbers = #tpu.dot_dimension_numbers<[1], [1], [0], [0], [0, 0, 1, 0], [], []>} : vector<128x128xf32>, vector<128x128xf32>, vector<128x128xf32> -> vector<128x128xf32>
    %cst_6 = arith.constant 1.000000e+01 : f32
    %14 = vector.broadcast %cst_6 : f32 to vector<128x128xf32>
    %15 = arith.mulf %13, %14 : vector<128x128xf32>
    %16 = tpu.iota {dimensions = array<i32: 1>} : vector<1x128xi32>
    %c128_i32 = arith.constant 128 : i32
    %17 = arith.muli %arg1, %c128_i32 : i32
    %18 = vector.broadcast %17 : i32 to vector<1x128xi32>
    %19 = arith.addi %16, %18 : vector<1x128xi32>
    %c0_7 = arith.constant 0 : index
    %c0_8 = arith.constant 0 : index
    %20 = vector.load %arg6[%c0_7, %c0_8] : memref<1x128xi32, #tpu.memory_space<vmem>>, vector<1x128xi32>
    %c0_9 = arith.constant 0 : index
    %c0_10 = arith.constant 0 : index
    %21 = vector.load %arg5[%c0_9, %c0_10] : memref<128x1xi32, #tpu.memory_space<vmem>>, vector<128x1xi32>
    %22 = vector.broadcast %20 : vector<1x128xi32> to vector<128x128xi32>
    %23 = vector.broadcast %21 : vector<128x1xi32> to vector<128x128xi32>
    %24 = arith.cmpi ne, %22, %23 : vector<128x128xi32>
    %c8_i32 = arith.constant 8 : i32
    %25 = vector.broadcast %c8_i32 : i32 to vector<1x128xi32>
    %26 = arith.cmpi slt, %19, %25 : vector<1x128xi32>
    %27 = vector.broadcast %26 : vector<1x128xi1> to vector<128x128xi1>
    %28 = arith.andi %24, %27 : vector<128x128xi1>
    %c0_11 = arith.constant 0 : index
    %c0_12 = arith.constant 0 : index
    %29 = vector.load %arg10[%c0_11, %c0_12] : memref<128x1xf32, #tpu.memory_space<vmem>>, vector<128x1xf32>
    %cst_13 = arith.constant -1.000000e+30 : f32
    %30 = vector.broadcast %cst_13 : f32 to vector<128x128xf32>
    %31 = arith.select %28, %15, %30 : vector<128x128xi1>, vector<128x128xf32>
    %cst_14 = arith.constant dense<0xFF800000> : vector<128xf32>
    %32 = vector.multi_reduction <maximumf>, %31, %cst_14 [1] : vector<128x128xf32> to vector<128xf32>
    %33 = vector.shape_cast %32 : vector<128xf32> to vector<128x1xf32>
    %34 = arith.maximumf %29, %33 : vector<128x1xf32>
    %35 = vector.broadcast %34 : vector<128x1xf32> to vector<128x128xf32>
    %36 = arith.subf %15, %35 : vector<128x128xf32>
    %37 = math.exp %36 : vector<128x128xf32>
    %cst_15 = arith.constant 0.000000e+00 : f32
    %38 = vector.broadcast %cst_15 : f32 to vector<128x128xf32>
    %39 = arith.select %28, %37, %38 : vector<128x128xi1>, vector<128x128xf32>
    %c0_16 = arith.constant 0 : index
    %c0_17 = arith.constant 0 : index
    %40 = vector.load %arg11[%c0_16, %c0_17] : memref<128x1xf32, #tpu.memory_space<vmem>>, vector<128x1xf32>
    %41 = arith.subf %29, %34 : vector<128x1xf32>
    %42 = math.exp %41 : vector<128x1xf32>
    %43 = arith.mulf %40, %42 : vector<128x1xf32>
    %cst_18 = arith.constant dense<0.000000e+00> : vector<128xf32>
    %44 = vector.multi_reduction <add>, %39, %cst_18 [1] : vector<128x128xf32> to vector<128xf32>
    %45 = vector.shape_cast %44 : vector<128xf32> to vector<128x1xf32>
    %46 = arith.addf %43, %45 : vector<128x1xf32>
    %c0_19 = arith.constant 0 : index
    %c0_20 = arith.constant 0 : index
    %47 = vector.load %arg11[%c0_19, %c0_20] : memref<128x1xf32, #tpu.memory_space<vmem>>, vector<128x1xf32>
    tpu.vector_store %arg11[%c0_19, %c0_20], %46 {strides = array<i32>} : memref<128x1xf32, #tpu.memory_space<vmem>>, vector<128x1xf32>,
    %c0_21 = arith.constant 0 : index
    %c0_22 = arith.constant 0 : index
    %48 = vector.load %arg10[%c0_21, %c0_22] : memref<128x1xf32, #tpu.memory_space<vmem>>, vector<128x1xf32>
    tpu.vector_store %arg10[%c0_21, %c0_22], %34 {strides = array<i32>} : memref<128x1xf32, #tpu.memory_space<vmem>>, vector<128x1xf32>,
    %c0_i32_23 = arith.constant 0 : i32
    %49 = arith.cmpi eq, %arg1, %c0_i32_23 : i32
    %50 = arith.extui %49 : i1 to i32
    %c0_i32_24 = arith.constant 0 : i32
    %51 = arith.cmpi ne, %50, %c0_i32_24 : i32
    scf.if %51 {
      %c0_25 = arith.constant 0 : index
      %c0_26 = arith.constant 0 : index
      %52 = vector.load %arg10[%c0_25, %c0_26] : memref<128x1xf32, #tpu.memory_space<vmem>>, vector<128x1xf32>
      %c0_27 = arith.constant 0 : index
      %c0_28 = arith.constant 0 : index
      %53 = vector.load %arg11[%c0_27, %c0_28] : memref<128x1xf32, #tpu.memory_space<vmem>>, vector<128x1xf32>
      %54 = math.log %53 : vector<128x1xf32>
      %55 = arith.addf %52, %54 : vector<128x1xf32>
      %c0_29 = arith.constant 0 : index
      %c0_30 = arith.constant 0 : index
      %56 = vector.load %arg9[%c0_29, %c0_30] : memref<128x1xf32, #tpu.memory_space<vmem>>, vector<128x1xf32>
      %57 = arith.subf %55, %56 : vector<128x1xf32>
      %58 = tpu.iota {dimensions = array<i32: 0>} : vector<128x1xi32>
      %c128_i32_31 = arith.constant 128 : i32
      %59 = arith.muli %arg0, %c128_i32_31 : i32
      %60 = vector.broadcast %59 : i32 to vector<128x1xi32>
      %61 = arith.addi %58, %60 : vector<128x1xi32>
      %c8_i32_32 = arith.constant 8 : i32
      %62 = vector.broadcast %c8_i32_32 : i32 to vector<128x1xi32>
      %63 = arith.cmpi slt, %61, %62 : vector<128x1xi32>
      %cst_33 = arith.constant 0.000000e+00 : f32
      %64 = vector.broadcast %cst_33 : f32 to vector<128x1xf32>
      %65 = arith.select %63, %57, %64 : vector<128x1xi1>, vector<128x1xf32>
      %c0_34 = arith.constant 0 : index
      %c0_35 = arith.constant 0 : index
      %66 = vector.load %arg7[%c0_34, %c0_35] : memref<128x1xf32, #tpu.memory_space<vmem>>, vector<128x1xf32>
      tpu.vector_store %arg7[%c0_34, %c0_35], %65 {strides = array<i32>} : memref<128x1xf32, #tpu.memory_space<vmem>>, vector<128x1xf32>,
    } else {
    }
    return
  }
  func.func @transform_0(%arg0: i32, %arg1: i32) -> (i32, i32) {
    %c0_i32 = arith.constant 0 : i32
    %c0_i32_0 = arith.constant 0 : i32
    return %arg0, %c0_i32 : i32, i32
  }
  func.func @transform_1(%arg0: i32, %arg1: i32) -> (i32, i32) {
    %c0_i32 = arith.constant 0 : i32
    %c0_i32_0 = arith.constant 0 : i32
    return %arg1, %c0_i32 : i32, i32
  }
  func.func @transform_2(%arg0: i32, %arg1: i32) -> (i32, i32) {
    %c0_i32 = arith.constant 0 : i32
    %c0_i32_0 = arith.constant 0 : i32
    return %arg0, %c0_i32 : i32, i32
  }
  func.func @transform_3(%arg0: i32, %arg1: i32) -> (i32, i32) {
    %c0_i32 = arith.constant 0 : i32
    %c0_i32_0 = arith.constant 0 : i32
    return %arg0, %c0_i32 : i32, i32
  }
  func.func @transform_4(%arg0: i32, %arg1: i32) -> (i32, i32) {
    %c0_i32 = arith.constant 0 : i32
    %c0_i32_0 = arith.constant 0 : i32
    return %c0_i32, %arg1 : i32, i32
  }
  func.func @transform_5(%arg0: i32, %arg1: i32) -> (i32, i32) {
    %c0_i32 = arith.constant 0 : i32
    %c0_i32_0 = arith.constant 0 : i32
    return %arg0, %c0_i32 : i32, i32
  }
}

</mosaic_0001>

<bundles_post_ra>
// kernel: tpu_custom_call.1
= control target key start
LH: loop header
LB: loop body
LE: loop exit
PB: predicated region body
PF: predicated region fallthrough
CT: control target
= control target key end

     0   :  { %10 = vsyncpa [#allocation7], 0  ;;  %s2805_s0 = inlined_call_operand.vmem [shape: f32[128,128], index: 0, kind: input, shape index: {}]   ;;  %s2806_s1 = inlined_call_operand.hbm [shape: f32[128,128], index: 1, kind: input, shape index: {}]   ;;  %s2807_s2 = inlined_call_operand.hbm [shape: f32[128,128], index: 2, kind: input, shape index: {}]   ;;  %s2808_s3 = inlined_call_operand.vmem [shape: s32[128,1], index: 3, kind: input, shape index: {}]   ;;  %s2809_s4 = inlined_call_operand.vmem [shape: s32[1,128], index: 4, kind: input, shape index: {}]   ;;  %s2810_s5 = inlined_call_operand.vmem [shape: f32[128,1], index: 5, kind: output, shape index: {}]  }
   0x1   :  { %11 = vsyncpa [#allocation9], 0  ;;  %s1748_s18 = smov [#allocation6]   ;;  %s1700_s22 = scalar_lea.hbm %s2806_s1, 2048 }
   0x2   :  { %s19_s19 = sshll.u32 %s1748_s18, 4  ;;  %p1701_p0 = scmp.ne.s32.totalorder %s2806_s1, %s1700_s22  ;;  %s20_s19 = int_to_ptr.vmem [resolvable:$true] %s19_s19 }
   0x3   :  { %p1704_p1 = scmp.lt.u32.totalorder %s1700_s22, %s2806_s1 }
   0x5   :  { %p1706_p2 = pnand %p1704_p1, %p1701_p0 }
   0x7   :  { %1709 = shalt.err (!%p1706_p2)
}
   0x8   :  { %s1710_s27 = scalar_lea.vmem %s20_s19, 2048  ;;  %p1715_p4 = scmp.lt.s32.totalorder %s20_s19, %s20_s19 }
   0x9   :  { %p1711_p3 = scmp.ne.s32.totalorder %s20_s19, %s1710_s27  ;;  %p1716_p5 = scmp.lt.s32.totalorder %s1710_s27, %s1710_s27 }
   0xb   :  { %p1717_p6 = por %p1716_p5, %p1715_p4 }
   0xd   :  { %p1718_p7 = pnand %p1717_p6, %p1711_p3 }
   0xf   :  { %1721 = shalt.err (!%p1718_p7)
}
  0x10   :  { %s1749_s28 = smov 128   ;;  %s1750_s29 = smov 8  }
  0x11   :  { %25 = dma.hbm_to_vmem [thread:$0]  %s2806_s1, 2048, %s20_s19, [#allocation7], %s1749_s28, %s1749_s28, %s1750_s29  }
  0x12   :  { %s1751_s7 = smov [#allocation8]   ;;  %s1722_s11 = scalar_lea.hbm %s2807_s2, 2048 }
  0x13   :  { %s31_s8 = sshll.u32 %s1751_s7, 4  ;;  %p1723_p8 = scmp.ne.s32.totalorder %s2807_s2, %s1722_s11  ;;  %s32_s8 = int_to_ptr.vmem [resolvable:$true] %s31_s8 }
  0x14   :  { %p1726_p9 = scmp.lt.u32.totalorder %s1722_s11, %s2807_s2 }
  0x16   :  { %p1728_p10 = pnand %p1726_p9, %p1723_p8 }
  0x18   :  { %1731 = shalt.err (!%p1728_p10)
}
  0x19   :  { %s1732_s16 = scalar_lea.vmem %s32_s8, 2048  ;;  %p1737_p12 = scmp.lt.s32.totalorder %s32_s8, %s32_s8 }
  0x1a   :  { %p1733_p11 = scmp.ne.s32.totalorder %s32_s8, %s1732_s16  ;;  %p1738_p13 = scmp.lt.s32.totalorder %s1732_s16, %s1732_s16 }
  0x1c   :  { %p1739_p0 = por %p1738_p13, %p1737_p12 }
  0x1e   :  { %p1740_p1 = pnand %p1739_p0, %p1733_p11 }
  0x20   :  { %1743 = shalt.err (!%p1740_p1)
}
  0x21   :  { %37 = dma.hbm_to_vmem [thread:$0]  %s2807_s2, 2048, %s32_s8, [#allocation9], %s1749_s28, %s1749_s28, %s1750_s29  }
  0x22   :  { %1744 = dma.done.wait [#allocation7], 2048  }
  0x23   :  { %1745 = vsyncadd [#allocation7], 4294965248 }
  0x24   :  { %1746 = dma.done.wait [#allocation9], 2048  }
  0x25   :  { %1747 = vsyncadd [#allocation9], 4294965248  ;;  %vm2815_vm0 = vcmask 7168   ;;  %v1752_v0 = vmov 0.0   ;;  %v1869_v1 = vld [vmem:[#allocation6 + $0x10] sm:$0xff]  ;;  %v1871_v2 = vld [vmem:[#allocation6] sm:$0xff] }
  0x26   :  { %1371 = vst.msk [vmem:[%s2810_s5 + $0x8] sm:$0xff] %vm2815_vm0, %v1752_v0  ;;  %1372 = vst.msk [vmem:[%s2810_s5 + $0x10] sm:$0xff] %vm2815_vm0, %v1752_v0  ;;  %v1873_v3 = vld [vmem:[#allocation6 + $0x18] sm:$0xff]  ;;  %v439_v4 = vmul.f32 %v1869_v1, %v1869_v1  ;;  %v437_v5 = vmul.f32 %v1871_v2, %v1871_v2  ;;  %v1879_v6 = vld [vmem:[#allocation6 + $0x8] sm:$0xff]  ;;  %v1753_v27 = vmov 0  }
  0x27   :  { %1373 = vst.msk [vmem:[%s2810_s5 + $0x18] sm:$0xff] %vm2815_vm0, %v1752_v0  ;;  %1374 = vst.msk [vmem:[%s2810_s5 + $0x20] sm:$0xff] %vm2815_vm0, %v1752_v0  ;;  %v440_v7 = vmul.f32 %v1873_v3, %v1873_v3  ;;  %v438_v8 = vmul.f32 %v1879_v6, %v1879_v6  ;;  %v1885_v9 = vld [vmem:[#allocation6 + $0x28] sm:$0xff]  ;;  %v1887_v10 = vld [vmem:[#allocation6 + $0x20] sm:$0xff]  ;;  %1537 = vset.pattern.permute.xlu1 %v1753_v27  ;;  %1536 = vset.pattern.permute.xlu0 %v1753_v27 }
  0x28   :  { %1375 = vst.msk [vmem:[%s2810_s5 + $0x28] sm:$0xff] %vm2815_vm0, %v1752_v0  ;;  %1376 = vst.msk [vmem:[%s2810_s5 + $0x30] sm:$0xff] %vm2815_vm0, %v1752_v0  ;;  %457 = vadd.xlane.f32.xlu1 %v439_v4  ;;  %453 = vadd.xlane.f32.xlu0 %v437_v5  ;;  %v442_v11 = vmul.f32 %v1885_v9, %v1885_v9  ;;  %v441_v12 = vmul.f32 %v1887_v10, %v1887_v10  ;;  %v1893_v13 = vld [vmem:[#allocation6 + $0x38] sm:$0xff]  ;;  %v1895_v14 = vld [vmem:[#allocation6 + $0x30] sm:$0xff] }
  0x29   :  { %1377 = vst.msk [vmem:[%s2810_s5 + $0x38] sm:$0xff] %vm2815_vm0, %v1752_v0  ;;  %1378 = vst.msk [vmem:[%s2810_s5 + $0x40] sm:$0xff] %vm2815_vm0, %v1752_v0  ;;  %v444_v15 = vmul.f32 %v1893_v13, %v1893_v13  ;;  %v443_v16 = vmul.f32 %v1895_v14, %v1895_v14  ;;  %v1901_v17 = vld [vmem:[#allocation6 + $0x48] sm:$0xff]  ;;  %v1903_v18 = vld [vmem:[#allocation6 + $0x40] sm:$0xff] }
  0x2a   :  { %1379 = vst.msk [vmem:[%s2810_s5 + $0x48] sm:$0xff] %vm2815_vm0, %v1752_v0  ;;  %1380 = vst.msk [vmem:[%s2810_s5 + $0x50] sm:$0xff] %vm2815_vm0, %v1752_v0  ;;  %v446_v19 = vmul.f32 %v1901_v17, %v1901_v17  ;;  %v445_v20 = vmul.f32 %v1903_v18, %v1903_v18  ;;  %v1909_v21 = vld [vmem:[#allocation6 + $0x58] sm:$0xff]  ;;  %v1911_v22 = vld [vmem:[#allocation6 + $0x50] sm:$0xff] }
  0x2b   :  { %1381 = vst.msk [vmem:[%s2810_s5 + $0x58] sm:$0xff] %vm2815_vm0, %v1752_v0  ;;  %1382 = vst.msk [vmem:[%s2810_s5 + $0x60] sm:$0xff] %vm2815_vm0, %v1752_v0  ;;  %v448_v23 = vmul.f32 %v1909_v21, %v1909_v21  ;;  %v447_v24 = vmul.f32 %v1911_v22, %v1911_v22  ;;  %v1917_v25 = vld [vmem:[#allocation6 + $0x68] sm:$0xff]  ;;  %v1919_v26 = vld [vmem:[#allocation6 + $0x60] sm:$0xff] }
  0x2c   :  { %1383 = vst.msk [vmem:[%s2810_s5 + $0x68] sm:$0xff] %vm2815_vm0, %v1752_v0  ;;  %1384 = vst.msk [vmem:[%s2810_s5 + $0x70] sm:$0xff] %vm2815_vm0, %v1752_v0  ;;  %459 = vadd.xlane.f32.xlu1 %v440_v7  ;;  %455 = vadd.xlane.f32.xlu0 %v438_v8  ;;  %v450_v28 = vmul.f32 %v1917_v25, %v1917_v25  ;;  %v449_v29 = vmul.f32 %v1919_v26, %v1919_v26  ;;  %v1925_v30 = vld [vmem:[#allocation6 + $0x78] sm:$0xff]  ;;  %v1927_v31 = vld [vmem:[#allocation6 + $0x70] sm:$0xff] }
  0x2d   :  { %1385 = vst.msk [vmem:[%s2810_s5 + $0x78] sm:$0xff] %vm2815_vm0, %v1752_v0  ;;  %v452_v32 = vmul.f32 %v1925_v30, %v1925_v30  ;;  %v451_v33 = vmul.f32 %v1927_v31, %v1927_v31  ;;  %v1936_v34 = vld [vmem:[%s2805_s0 + $0x8] sm:$0xff]  ;;  %v1941_v35 = vld [vmem:[%s2805_s0] sm:$0xff]  ;;  %v1964_v42 = vld [vmem:[%s2805_s0 + $0x50] sm:$0xff] }
  0x2e   :  { %v69_v36 = vmul.f32 %v1936_v34, %v1936_v34  ;;  %v68_v37 = vmul.f32 %v1941_v35, %v1941_v35  ;;  %v1950_v38 = vld [vmem:[%s2805_s0 + $0x48] sm:$0xff]  ;;  %v1955_v39 = vld [vmem:[%s2805_s0 + $0x40] sm:$0xff]  ;;  %v1969_v43 = vld [vmem:[%s2805_s0 + $0x10] sm:$0xff]  ;;  %v78_v44 = vmul.f32 %v1964_v42, %v1964_v42 }
  0x2f   :  { %v77_v40 = vmul.f32 %v1950_v38, %v1950_v38  ;;  %v76_v41 = vmul.f32 %v1955_v39, %v1955_v39  ;;  %v70_v45 = vmul.f32 %v1969_v43, %v1969_v43  ;;  %v1978_v46 = vld [vmem:[%s2805_s0 + $0x58] sm:$0xff]  ;;  %v1992_v50 = vld [vmem:[%s2805_s0 + $0x60] sm:$0xff]  ;;  %v2006_v54 = vld [vmem:[%s2805_s0 + $0x68] sm:$0xff] }
  0x30   :  { %463 = vadd.xlane.f32.xlu1 %v442_v11  ;;  %461 = vadd.xlane.f32.xlu0 %v441_v12  ;;  %v1983_v47 = vld [vmem:[%s2805_s0 + $0x18] sm:$0xff]  ;;  %v79_v48 = vmul.f32 %v1978_v46, %v1978_v46  ;;  %v1997_v51 = vld [vmem:[%s2805_s0 + $0x20] sm:$0xff]  ;;  %v80_v52 = vmul.f32 %v1992_v50, %v1992_v50  ;;  %v2011_v55 = vld [vmem:[%s2805_s0 + $0x28] sm:$0xff]  ;;  %v81_v56 = vmul.f32 %v2006_v54, %v2006_v54 }
  0x31   :  { %v71_v49 = vmul.f32 %v1983_v47, %v1983_v47  ;;  %v72_v53 = vmul.f32 %v1997_v51, %v1997_v51  ;;  %v73_v57 = vmul.f32 %v2011_v55, %v2011_v55  ;;  %v2020_v58 = vld [vmem:[%s2805_s0 + $0x70] sm:$0xff]  ;;  %v2034_v62 = vld [vmem:[%s2805_s0 + $0x78] sm:$0xff]  ;;  %v2045_v5 = vld [vmem:[#allocation8 + $0x8] sm:$0xff] }
  0x32   :  { %v2025_v59 = vld [vmem:[%s2805_s0 + $0x30] sm:$0xff]  ;;  %v82_v60 = vmul.f32 %v2020_v58, %v2020_v58  ;;  %v2039_v63 = vld [vmem:[%s2805_s0 + $0x38] sm:$0xff]  ;;  %v83_v0 = vmul.f32 %v2034_v62, %v2034_v62  ;;  %v2047_v7 = vld [vmem:[#allocation8] sm:$0xff]  ;;  %v197_v8 = vmul.f32 %v2045_v5, %v2045_v5 }
  0x33   :  { %v74_v61 = vmul.f32 %v2025_v59, %v2025_v59  ;;  %v75_v4 = vmul.f32 %v2039_v63, %v2039_v63  ;;  %v196_v11 = vmul.f32 %v2047_v7, %v2047_v7  ;;  %v2053_v12 = vld [vmem:[#allocation8 + $0x18] sm:$0xff] }
  0x34   :  { %467 = vadd.xlane.f32.xlu1 %v444_v15  ;;  %465 = vadd.xlane.f32.xlu0 %v443_v16  ;;  %v2055_v15 = vld [vmem:[#allocation8 + $0x10] sm:$0xff]  ;;  %v199_v16 = vmul.f32 %v2053_v12, %v2053_v12 }
  0x38   :  { %471 = vadd.xlane.f32.xlu1 %v446_v19  ;;  %469 = vadd.xlane.f32.xlu0 %v445_v20  ;;  %v198_v19 = vmul.f32 %v2055_v15, %v2055_v15  ;;  %v2061_v20 = vld [vmem:[#allocation8 + $0x28] sm:$0xff] }
  0x3c   :  { %475 = vadd.xlane.f32.xlu1 %v448_v23  ;;  %473 = vadd.xlane.f32.xlu0 %v447_v24  ;;  %v2063_v23 = vld [vmem:[#allocation8 + $0x20] sm:$0xff]  ;;  %v201_v24 = vmul.f32 %v2061_v20, %v2061_v20 }
  0x3d   :  { %v200_v27 = vmul.f32 %v2063_v23, %v2063_v23 }
  0x40   :  { %479 = vadd.xlane.f32.xlu1 %v450_v28  ;;  %477 = vadd.xlane.f32.xlu0 %v449_v29  ;;  %v2069_v28 = vld [vmem:[#allocation8 + $0x38] sm:$0xff]  ;;  %v2071_v29 = vld [vmem:[#allocation8 + $0x30] sm:$0xff] }
  0x44   :  { %483 = vadd.xlane.f32.xlu1 %v452_v32  ;;  %481 = vadd.xlane.f32.xlu0 %v451_v33  ;;  %v203_v32 = vmul.f32 %v2069_v28, %v2069_v28  ;;  %v202_v33 = vmul.f32 %v2071_v29, %v2071_v29 }
  0x48   :  { %86 = vadd.xlane.f32.xlu1 %v69_v36  ;;  %84 = vadd.xlane.f32.xlu0 %v68_v37  ;;  %v2077_v36 = vld [vmem:[#allocation8 + $0x48] sm:$0xff]  ;;  %v2079_v37 = vld [vmem:[#allocation8 + $0x40] sm:$0xff] }
  0x4c   :  { %102 = vadd.xlane.f32.xlu1 %v77_v40  ;;  %100 = vadd.xlane.f32.xlu0 %v76_v41  ;;  %v205_v40 = vmul.f32 %v2077_v36, %v2077_v36  ;;  %v204_v41 = vmul.f32 %v2079_v37, %v2079_v37 }
  0x50   :  { %104 = vadd.xlane.f32.xlu1 %v78_v44  ;;  %88 = vadd.xlane.f32.xlu0 %v70_v45  ;;  %v2085_v44 = vld [vmem:[#allocation8 + $0x58] sm:$0xff]  ;;  %v2087_v45 = vld [vmem:[#allocation8 + $0x50] sm:$0xff] }
  0x54   :  { %106 = vadd.xlane.f32.xlu1 %v79_v48  ;;  %90 = vadd.xlane.f32.xlu0 %v71_v49  ;;  %v207_v48 = vmul.f32 %v2085_v44, %v2085_v44  ;;  %v206_v49 = vmul.f32 %v2087_v45, %v2087_v45 }
  0x58   :  { %108 = vadd.xlane.f32.xlu1 %v80_v52  ;;  %92 = vadd.xlane.f32.xlu0 %v72_v53  ;;  %v2093_v52 = vld [vmem:[#allocation8 + $0x60] sm:$0xff]  ;;  %v2095_v53 = vld [vmem:[#allocation8 + $0x68] sm:$0xff] }
  0x59   :  { %2840 = vst [vmem:[#allocation12_spill] sm:$0xff] %v2093_v52  ;;  %2841 = vst [vmem:[#allocation13_spill] sm:$0xff] %v2095_v53 }
  0x5c   :  { %110 = vadd.xlane.f32.xlu1 %v81_v56  ;;  %94 = vadd.xlane.f32.xlu0 %v73_v57  ;;  %v208_v56 = vmul.f32 %v2093_v52, %v2093_v52  ;;  %v209_v57 = vmul.f32 %v2095_v53, %v2095_v53 }
  0x60   :  { %112 = vadd.xlane.f32.xlu1 %v82_v60  ;;  %96 = vadd.xlane.f32.xlu0 %v74_v61  ;;  %v2101_v60 = vld [vmem:[#allocation8 + $0x70] sm:$0xff]  ;;  %v2103_v61 = vld [vmem:[#allocation8 + $0x78] sm:$0xff] }
  0x61   :  { %2842 = vst [vmem:[#allocation14_spill] sm:$0xff] %v2101_v60  ;;  %2843 = vst [vmem:[#allocation15_spill] sm:$0xff] %v2103_v61 }
  0x64   :  { %114 = vadd.xlane.f32.xlu1 %v83_v0  ;;  %98 = vadd.xlane.f32.xlu0 %v75_v4  ;;  %v210_v0 = vmul.f32 %v2101_v60, %v2101_v60  ;;  %v211_v4 = vmul.f32 %v2103_v61, %v2103_v61 }
  0x68   :  { %214 = vadd.xlane.f32.xlu1 %v197_v8  ;;  %212 = vadd.xlane.f32.xlu0 %v196_v11  ;;  %v701_v8 = vld [vmem:[%s2808_s3 + $0x8] sm:$0xff]  ;;  %v702_v11 = vld [vmem:[%s2808_s3 + $0x10] sm:$0xff] }
  0x6c   :  { %218 = vadd.xlane.f32.xlu1 %v199_v16  ;;  %216 = vadd.xlane.f32.xlu0 %v198_v19  ;;  %v700_v16 = vld [vmem:[%s2808_s3] sm:$0xff]  ;;  %v703_v19 = vld [vmem:[%s2808_s3 + $0x18] sm:$0xff] }
  0x70   :  { %222 = vadd.xlane.f32.xlu1 %v201_v24  ;;  %220 = vadd.xlane.f32.xlu0 %v200_v27  ;;  %v709_v24 = vld [vmem:[%s2808_s3 + $0x48] sm:$0xff]  ;;  %v704_v27 = vld [vmem:[%s2808_s3 + $0x20] sm:$0xff] }
  0x74   :  { %226 = vadd.xlane.f32.xlu1 %v203_v32  ;;  %224 = vadd.xlane.f32.xlu0 %v202_v33  ;;  %v711_v32 = vld [vmem:[%s2808_s3 + $0x58] sm:$0xff]  ;;  %v705_v33 = vld [vmem:[%s2808_s3 + $0x28] sm:$0xff] }
  0x78   :  { %230 = vadd.xlane.f32.xlu1 %v205_v40  ;;  %228 = vadd.xlane.f32.xlu0 %v204_v41  ;;  %v713_v40 = vld [vmem:[%s2808_s3 + $0x68] sm:$0xff]  ;;  %v706_v41 = vld [vmem:[%s2808_s3 + $0x30] sm:$0xff] }
  0x7c   :  { %234 = vadd.xlane.f32.xlu1 %v207_v48  ;;  %232 = vadd.xlane.f32.xlu0 %v206_v49  ;;  %v715_v48 = vld [vmem:[%s2808_s3 + $0x78] sm:$0xff] }
  0x7d   :  { %v707_v49 = vld [vmem:[%s2808_s3 + $0x38] sm:$0xff] }
  0x80   :  { %236 = vadd.xlane.f32.xlu0 %v208_v56  ;;  %238 = vadd.xlane.f32.xlu1 %v209_v57  ;;  %v708_v56 = vld [vmem:[%s2808_s3 + $0x40] sm:$0xff]  ;;  %v710_v57 = vld [vmem:[%s2808_s3 + $0x50] sm:$0xff] }
  0x84   :  { %240 = vadd.xlane.f32.xlu0 %v210_v0  ;;  %242 = vadd.xlane.f32.xlu1 %v211_v4 }
  0x95   :  { %724 = vperm.xlu1 %1537, %v701_v8  }
  0x99   :  { %727 = vperm.xlu1 %1537, %v702_v11   ;;  %v712_v11 = vld [vmem:[%s2808_s3 + $0x60] sm:$0xff] }
  0x9a   :  { %721 = vperm.xlu0 %1536, %v700_v16  }
  0x9d   :  { %730 = vperm.xlu1 %1537, %v703_v19  }
  0x9e   :  { %748 = vperm.xlu0 %1536, %v709_v24  }
  0xa1   :  { %733 = vperm.xlu1 %1537, %v704_v27  }
  0xa2   :  { %754 = vperm.xlu0 %1536, %v711_v32  }
  0xa5   :  { %736 = vperm.xlu1 %1537, %v705_v33   ;;  %v714_v33 = vld [vmem:[%s2808_s3 + $0x70] sm:$0xff] }
  0xa6   :  { %760 = vperm.xlu0 %1536, %v713_v40  }
  0xa9   :  { %739 = vperm.xlu1 %1537, %v706_v41  }
  0xaa   :  { %766 = vperm.xlu0 %1536, %v715_v48  }
  0xad   :  { %742 = vperm.xlu1 %1537, %v707_v49  }
  0xb1   :  { %745 = vperm.xlu1 %1537, %v708_v56  }
  0xb5   :  { %v458_v0 = vpop.xlane.xlu1 %457  ;;  %v454_v4 = vpop.xlane.xlu0 %453  ;;  %751 = vperm.xlu1 %1537, %v710_v57  }
  0xb6   :  { %v487_v8 = vmax.f32 %v458_v0, 1e-24  ;;  %v485_v16 = vmax.f32 %v454_v4, 1e-24 }
  0xb8   :  { %1538 = vrsqrt.f32 %v487_v8 }
  0xb9   :  { %v460_v19 = vpop.xlane.xlu1 %459  ;;  %v456_v24 = vpop.xlane.xlu0 %455  ;;  %757 = vperm.xlu1 %1537, %v712_v11   ;;  %1540 = vrsqrt.f32 %v485_v16 }
  0xba   :  { %v488_v27 = vmax.f32 %v460_v19, 1e-24  ;;  %v486_v32 = vmax.f32 %v456_v24, 1e-24 }
  0xbc   :  { %1542 = vrsqrt.f32 %v488_v27 }
  0xbd   :  { %1544 = vrsqrt.f32 %v486_v32  ;;  %v464_v40 = vpop.xlane.xlu1 %463  ;;  %v462_v41 = vpop.xlane.xlu0 %461  ;;  %763 = vperm.xlu1 %1537, %v714_v33  }
  0xbe   :  { %v490_v48 = vmax.f32 %v464_v40, 1e-24  ;;  %v489_v49 = vmax.f32 %v462_v41, 1e-24 }
  0xc0   :  { %1546 = vrsqrt.f32 %v490_v48 }
  0xc1   :  { %1548 = vrsqrt.f32 %v489_v49  ;;  %v468_v56 = vpop.xlane.xlu1 %467  ;;  %v466_v57 = vpop.xlane.xlu0 %465 }
  0xc2   :  { %v1539_v0 = vpop.eup %1538  ;;  %v492_v4 = vmax.f32 %v468_v56, 1e-24  ;;  %v491_v11 = vmax.f32 %v466_v57, 1e-24 }
  0xc3   :  { %v1541_v8 = vpop.eup %1540  ;;  %v519_v16 = vmul.f32 %v1539_v0, %v1869_v1 }
  0xc4   :  { %1550 = vrsqrt.f32 %v492_v4  ;;  %v517_v33 = vmul.f32 %v1541_v8, %v1871_v2 }
  0xc5   :  { %v472_v19 = vpop.xlane.xlu1 %471  ;;  %v470_v24 = vpop.xlane.xlu0 %469  ;;  %1552 = vrsqrt.f32 %v491_v11 }
  0xc6   :  { %v1543_v61 = vpop.eup %1542  ;;  %v494_v53 = vmax.f32 %v472_v19, 1e-24  ;;  %v493_v52 = vmax.f32 %v470_v24, 1e-24 }
  0xc7   :  { %v1545_v27 = vpop.eup %1544  ;;  %v520_v32 = vmul.f32 %v1543_v61, %v1873_v3 }
  0xc8   :  { %v518_v40 = vmul.f32 %v1545_v27, %v1879_v6  ;;  %1554 = vrsqrt.f32 %v494_v53 }
  0xc9   :  { %v476_v41 = vpop.xlane.xlu1 %475  ;;  %v474_v48 = vpop.xlane.xlu0 %473  ;;  %v1485_v60 = vpack.c.bf16 %v520_v32, %v519_v16  ;;  %1556 = vrsqrt.f32 %v493_v52 }
  0xca   :  { %v1547_v49 = vpop.eup %1546  ;;  %v1481_v56 = vpack.c.bf16 %v518_v40, %v517_v33  ;;  %v496_v19 = vmax.f32 %v476_v41, 1e-24  ;;  %v495_v16 = vmax.f32 %v474_v48, 1e-24 }
  0xcb   :  { %v1549_v57 = vpop.eup %1548  ;;  %v522_v6 = vmul.f32 %v1547_v49, %v1885_v9 }
  0xcc   :  { %1482 = vmatprep.subr.bf16.mxu0 %v1481_v56  ;;  %1513 = vmatprep.subr.bf16.mxu1 %v1481_v56  ;;  %v521_v2 = vmul.f32 %v1549_v57, %v1887_v10  ;;  %1558 = vrsqrt.f32 %v496_v19 }
  0xcd   :  { %1484 = vmatpush3.bf16.xpose.msra.mxu0 %v1481_v56  ;;  %1521 = vmatpush3.bf16.xpose.msra.mxu1 %v1481_v56  ;;  %v480_v1 = vpop.xlane.xlu1 %479  ;;  %v478_v3 = vpop.xlane.xlu0 %477  ;;  %1560 = vrsqrt.f32 %v495_v16 }
  0xce   :  { %1486 = vmatprep.subr.bf16.mxu0 %v1485_v60  ;;  %1514 = vmatprep.subr.bf16.mxu1 %v1485_v60  ;;  %v1551_v4 = vpop.eup %1550  ;;  %v1489_v8 = vpack.c.bf16 %v522_v6, %v521_v2  ;;  %v498_v48 = vmax.f32 %v480_v1, 1e-24  ;;  %v497_v49 = vmax.f32 %v478_v3, 1e-24 }
  0xcf   :  { %v1553_v11 = vpop.eup %1552  ;;  %v524_v9 = vmul.f32 %v1551_v4, %v1893_v13 }
  0xd0   :  { %v523_v10 = vmul.f32 %v1553_v11, %v1895_v14 }
  0xd1   :  { %v484_v61 = vpop.xlane.xlu1 %483  ;;  %v482_v0 = vpop.xlane.xlu0 %481 }
  0xd2   :  { %v1555_v33 = vpop.eup %1554  ;;  %v1493_v41 = vpack.c.bf16 %v524_v9, %v523_v10  ;;  %v500_v3 = vmax.f32 %v484_v61, 1e-24  ;;  %v499_v16 = vmax.f32 %v482_v0, 1e-24 }
  0xd3   :  { %v526_v14 = vmul.f32 %v1555_v33, %v1901_v17 }
  0xd5   :  { %1488 = vmatpush3.bf16.xpose.msra.mxu0 %v1485_v60  ;;  %1522 = vmatpush3.bf16.xpose.msra.mxu1 %v1485_v60  ;;  %v2163_v24 = vpop.xlane.xlu1 %86  ;;  %v85_v27 = vpop.xlane.xlu0 %84 }
  0xd6   :  { %v116_v32 = vmax.f32 %v85_v27, 1e-24  ;;  %1490 = vmatprep.subr.bf16.mxu0 %v1489_v8  ;;  %1515 = vmatprep.subr.bf16.mxu1 %v1489_v8  ;;  %v1557_v60 = vpop.eup %1556 }
  0xd7   :  { %v525_v13 = vmul.f32 %v1557_v60, %v1903_v18  ;;  %v1559_v2 = vpop.eup %1558 }
  0xd8   :  { %1562 = vrsqrt.f32 %v116_v32  ;;  %v1561_v11 = vpop.eup %1560  ;;  %v528_v18 = vmul.f32 %v1559_v2, %v1909_v21 }
  0xd9   :  { %v2167_v52 = vpop.xlane.xlu1 %102  ;;  %v101_v53 = vpop.xlane.xlu0 %100  ;;  %v1497_v19 = vpack.c.bf16 %v526_v14, %v525_v13  ;;  %v527_v17 = vmul.f32 %v1561_v11, %v1911_v22  ;;  %v117_v22 = vmax.f32 %v2163_v24, 1e-24 }
  0xda   :  { %v124_v40 = vmax.f32 %v101_v53, 1e-24 }
  0xdc   :  { %1564 = vrsqrt.f32 %v124_v40 }
  0xdd   :  { %1492 = vmatpush3.bf16.xpose.msra.mxu0 %v1489_v8  ;;  %1523 = vmatpush3.bf16.xpose.msra.mxu1 %v1489_v8  ;;  %v105_v56 = vpop.xlane.xlu1 %104  ;;  %v89_v57 = vpop.xlane.xlu0 %88  ;;  %1566 = vrsqrt.f32 %v498_v48 }
  0xde   :  { %1494 = vmatprep.subr.bf16.mxu0 %v1493_v41  ;;  %1516 = vmatprep.subr.bf16.mxu1 %v1493_v41  ;;  %1568 = vrsqrt.f32 %v497_v49  ;;  %v126_v48 = vmax.f32 %v105_v56, 1e-24  ;;  %v118_v49 = vmax.f32 %v89_v57, 1e-24 }
  0xdf   :  { %1570 = vrsqrt.f32 %v500_v3 }
  0xe0   :  { %1572 = vrsqrt.f32 %v499_v16 }
  0xe1   :  { %v107_v6 = vpop.xlane.xlu1 %106  ;;  %v91_v4 = vpop.xlane.xlu0 %90  ;;  %1574 = vrsqrt.f32 %v117_v22 }
  0xe2   :  { %v1563_v1 = vpop.eup %1562  ;;  %v127_v14 = vmax.f32 %v107_v6, 1e-24 }
  0xe3   :  { %v2172_v32 = vmul.f32 %v1563_v1, %v1941_v35  ;;  %v1501_v35 = vpack.c.bf16 %v528_v18, %v527_v17 }
  0xe5   :  { %1496 = vmatpush3.bf16.xpose.msra.mxu0 %v1493_v41  ;;  %1524 = vmatpush3.bf16.xpose.msra.mxu1 %v1493_v41  ;;  %v109_v8 = vpop.xlane.xlu1 %108  ;;  %v93_v27 = vpop.xlane.xlu0 %92  ;;  %v125_v41 = vmax.f32 %v2167_v52, 1e-24 }
  0xe6   :  { %1498 = vmatprep.subr.bf16.mxu0 %v1497_v19  ;;  %1517 = vmatprep.subr.bf16.mxu1 %v1497_v19  ;;  %v1565_v10 = vpop.eup %1564  ;;  %v128_v52 = vmax.f32 %v109_v8, 1e-24  ;;  %v120_v6 = vmax.f32 %v93_v27, 1e-24 }
  0xe7   :  { %1457 = vmatprep.mubr.f32.mxu0 %v2172_v32  ;;  %v2178_v61 = vmul.f32 %v1565_v10, %v1955_v39  ;;  %v1567_v53 = vpop.eup %1566  ;;  %1576 = vrsqrt.f32 %v125_v41 }
  0xe8   :  { %v1569_v33 = vpop.eup %1568  ;;  %v530_v60 = vmul.f32 %v1567_v53, %v1917_v25  ;;  %1578 = vrsqrt.f32 %v126_v48 }
  0xe9   :  { %v2180_v0 = vpop.xlane.xlu1 %110  ;;  %v95_v9 = vpop.xlane.xlu0 %94  ;;  %1469 = vmatprep.mubr.f32.mxu1 %v2178_v61  ;;  %v529_v39 = vmul.f32 %v1569_v33, %v1919_v26  ;;  %1580 = vrsqrt.f32 %v118_v49 }
  0xea   :  { %v1571_v13 = vpop.eup %1570  ;;  %1582 = vrsqrt.f32 %v127_v14 }
  0xeb   :  { %v1573_v11 = vpop.eup %1572  ;;  %v1505_v1 = vpack.c.bf16 %v530_v60, %v529_v39  ;;  %v532_v57 = vmul.f32 %v1571_v13, %v1925_v30  ;;  %v129_v39 = vmax.f32 %v2180_v0, 1e-24 }
  0xec   :  { %v531_v56 = vmul.f32 %v1573_v11, %v1927_v31  ;;  %v1575_v31 = vpop.eup %1574 }
  0xed   :  { %1500 = vmatpush3.bf16.xpose.msra.mxu0 %v1497_v19  ;;  %1525 = vmatpush3.bf16.xpose.msra.mxu1 %v1497_v19  ;;  %v2184_v21 = vpop.xlane.xlu1 %112  ;;  %v97_v40 = vpop.xlane.xlu0 %96  ;;  %v119_v19 = vmax.f32 %v91_v4, 1e-24  ;;  %v121_v4 = vmax.f32 %v95_v9, 1e-24 }
  0xee   :  { %1502 = vmatprep.subr.bf16.mxu0 %v1501_v35  ;;  %1518 = vmatprep.subr.bf16.mxu1 %v1501_v35  ;;  %v1509_v18 = vpack.c.bf16 %v532_v57, %v531_v56  ;;  %v122_v10 = vmax.f32 %v97_v40, 1e-24  ;;  %v130_v49 = vmax.f32 %v2184_v21, 1e-24 }
  0xef   :  { %1584 = vrsqrt.f32 %v119_v19  ;;  %v149_v19 = vmul.f32 %v1575_v31, %v1936_v34 }
  0xf0   :  { %1586 = vrsqrt.f32 %v128_v52 }
  0xf1   :  { %v2189_v2 = vpop.xlane.xlu1 %114  ;;  %v99_v24 = vpop.xlane.xlu0 %98 }
  0xf2   :  { %v123_v30 = vmax.f32 %v99_v24, 1e-24  ;;  %v1577_v33 = vpop.eup %1576 }
  0xf3   :  { %v1579_v27 = vpop.eup %1578 }
  0xf4   :  { %v1581_v41 = vpop.eup %1580 }
  0xf5   :  { %1504 = vmatpush3.bf16.xpose.msra.mxu0 %v1501_v35  ;;  %1526 = vmatpush3.bf16.xpose.msra.mxu1 %v1501_v35  ;;  %v215_v26 = vpop.xlane.xlu1 %214  ;;  %v213_v25 = vpop.xlane.xlu0 %212 }
  0xf6   :  { %v245_v3 = vmax.f32 %v215_v26, 1e-24  ;;  %v244_v16 = vmax.f32 %v213_v25, 1e-24  ;;  %1506 = vmatprep.subr.bf16.mxu0 %v1505_v1  ;;  %1519 = vmatprep.subr.bf16.mxu1 %v1505_v1  ;;  %v1583_v40 = vpop.eup %1582  ;;  %v131_v25 = vmax.f32 %v2189_v2, 1e-24 }
  0xf8   :  { %1588 = vrsqrt.f32 %v245_v3 }
  0xf9   :  { %1590 = vrsqrt.f32 %v244_v16  ;;  %v219_v8 = vpop.xlane.xlu1 %218  ;;  %v217_v17 = vpop.xlane.xlu0 %216 }
  0xfa   :  { %1592 = vrsqrt.f32 %v120_v6  ;;  %v247_v53 = vmax.f32 %v219_v8, 1e-24  ;;  %v246_v35 = vmax.f32 %v217_v17, 1e-24  ;;  %v1585_v13 = vpop.eup %1584 }
  0xfb   :  { %1594 = vrsqrt.f32 %v121_v4  ;;  %v2195_v14 = vpop.eup %1586  ;;  %v151_v4 = vmul.f32 %v1585_v13, %v1983_v47 }
  0xfc   :  { %1596 = vrsqrt.f32 %v247_v53 }
  0xfd   :  { %1598 = vrsqrt.f32 %v246_v35  ;;  %1508 = vmatpush3.bf16.xpose.msra.mxu0 %v1505_v1  ;;  %1527 = vmatpush3.bf16.xpose.msra.mxu1 %v1505_v1  ;;  %v223_v22 = vpop.xlane.xlu1 %222  ;;  %v221_v9 = vpop.xlane.xlu0 %220 }
  0xfe   :  { %1600 = vrsqrt.f32 %v122_v10  ;;  %v249_v60 = vmax.f32 %v223_v22, 1e-24  ;;  %v248_v48 = vmax.f32 %v221_v9, 1e-24  ;;  %1510 = vmatprep.subr.bf16.mxu0 %v1509_v18  ;;  %1520 = vmatprep.subr.bf16.mxu1 %v1509_v18 }
  0xff   :  { %1602 = vrsqrt.f32 %v123_v30 }
 0x100   :  { %1604 = vrsqrt.f32 %v249_v60 }
 0x101   :  { %1606 = vrsqrt.f32 %v248_v48  ;;  %v227_v24 = vpop.xlane.xlu1 %226  ;;  %v225_v11 = vpop.xlane.xlu0 %224 }
 0x102   :  { %v1589_v1 = vpop.eup %1588  ;;  %1608 = vrsqrt.f32 %v129_v39  ;;  %v251_v0 = vmax.f32 %v227_v24, 1e-24  ;;  %v250_v52 = vmax.f32 %v225_v11, 1e-24  ;;  %v160_v24 = vmul.f32 %v2195_v14, %v1992_v50 }
 0x103   :  { %v1591_v26 = vpop.eup %1590  ;;  %1610 = vrsqrt.f32 %v130_v49  ;;  %v277_v21 = vmul.f32 %v1589_v1, %v2045_v5  ;;  %v150_v5 = vmul.f32 %v1581_v41, %v1969_v43  ;;  %v2210_v43 = vmul.f32 %v1579_v27, %v1964_v42 }
 0x104   :  { %v1593_v56 = vpop.eup %1592  ;;  %1612 = vrsqrt.f32 %v251_v0  ;;  %v276_v57 = vmul.f32 %v1591_v26, %v2047_v7  ;;  %v159_v42 = vmul.f32 %v1583_v40, %v1978_v46 }
 0x105   :  { %v1595_v6 = vpop.eup %1594  ;;  %1614 = vrsqrt.f32 %v250_v52  ;;  %1512 = vmatpush3.bf16.xpose.msra.mxu0 %v1509_v18  ;;  %1528 = vmatpush3.bf16.xpose.msra.mxu1 %v1509_v18  ;;  %v231_v3 = vpop.xlane.xlu1 %230  ;;  %v293_v16 = vmul.f32 %v277_v21, %v149_v19  ;;  %v2206_v18 = vmul.f32 %v1577_v33, %v1950_v38  ;;  %v152_v48 = vmul.f32 %v1593_v56, %v1997_v51 }
 0x106   :  { %v229_v34 = vpop.xlane.xlu0 %228  ;;  %v1597_v8 = vpop.eup %1596  ;;  %v253_v17 = vmax.f32 %v231_v3, 1e-24  ;;  %v292_v2 = vmul.f32 %v276_v57, %v2172_v32  ;;  %1616 = vrsqrt.f32 %v131_v25  ;;  %v153_v9 = vmul.f32 %v1595_v6, %v2011_v55 }
 0x107   :  { %v252_v10 = vmax.f32 %v229_v34, 1e-24  ;;  %v1599_v53 = vpop.eup %1598  ;;  %310 = vadd.xlane.f32.xlu0 %v293_v16  ;;  %v279_v7 = vmul.f32 %v1597_v8, %v2053_v12 }
 0x108   :  { %v1601_v35 = vpop.eup %1600  ;;  %1618 = vrsqrt.f32 %v253_v17  ;;  %308 = vadd.xlane.f32.xlu1 %v292_v2  ;;  %v278_v47 = vmul.f32 %v1599_v53, %v2055_v15  ;;  %v2844_v2 = vld [vmem:[#allocation12_spill] sm:$0xff]  ;;  %v2845_v53 = vld [vmem:[#allocation13_spill] sm:$0xff] }
 0x109   :  { %v1603_v31 = vpop.eup %1602  ;;  %1620 = vrsqrt.f32 %v252_v10  ;;  %v235_v30 = vpop.xlane.xlu1 %234  ;;  %v295_v32 = vmul.f32 %v279_v7, %v151_v4 }
 0x10a   :  { %v233_v22 = vpop.xlane.xlu0 %232  ;;  %v1605_v41 = vpop.eup %1604  ;;  %v255_v12 = vmax.f32 %v235_v30, 1e-24  ;;  %v294_v60 = vmul.f32 %v278_v47, %v150_v5  ;;  %v2846_v47 = vld [vmem:[#allocation14_spill] sm:$0xff] }
 0x10b   :  { %v254_v39 = vmax.f32 %v233_v22, 1e-24  ;;  %v1607_v38 = vpop.eup %1606  ;;  %314 = vadd.xlane.f32.xlu0 %v295_v32  ;;  %v281_v15 = vmul.f32 %v1605_v41, %v2061_v20  ;;  %v155_v20 = vmul.f32 %v1603_v31, %v2039_v63 }
 0x10c   :  { %v1609_v33 = vpop.eup %1608  ;;  %1622 = vrsqrt.f32 %v255_v12  ;;  %1458 = vmatmul.mubr.f32.vlgmr.msra.gmra.mrb[0].mxu0 %v149_v19  ;;  %1470 = vmatmul.mubr.f32.vlgmr.msra.gmra.mrb[0].mxu1 %v2206_v18  ;;  %v280_v27 = vmul.f32 %v1607_v38, %v2063_v23  ;;  %v154_v23 = vmul.f32 %v1601_v35, %v2025_v59 }
 0x10d   :  { %v1611_v55 = vpop.eup %1610  ;;  %1624 = vrsqrt.f32 %v254_v39  ;;  %312 = vadd.xlane.f32.xlu1 %v294_v60  ;;  %1460 = vmatprep.mubr.f32.mxu0 %v150_v5  ;;  %v239_v13 = vpop.xlane.xlu1 %238  ;;  %v297_v51 = vmul.f32 %v281_v15, %v153_v9  ;;  %v161_v52 = vmul.f32 %v1609_v33, %v2006_v54 }
 0x10e   :  { %v237_v49 = vpop.xlane.xlu0 %236  ;;  %v1613_v11 = vpop.eup %1612  ;;  %1472 = vmatprep.mubr.f32.mxu1 %v2210_v43  ;;  %v257_v1 = vmax.f32 %v239_v13, 1e-24  ;;  %v296_v46 = vmul.f32 %v280_v27, %v152_v48 }
 0x10f   :  { %v256_v19 = vmax.f32 %v237_v49, 1e-24  ;;  %v1615_v40 = vpop.eup %1614  ;;  %318 = vadd.xlane.f32.xlu0 %v297_v51  ;;  %v283_v0 = vmul.f32 %v1613_v11, %v2069_v28  ;;  %v162_v28 = vmul.f32 %v1611_v55, %v2020_v58 }
 0x110   :  { %1461 = vmatmul.mubr.f32.gmra.mrb[2].mxu0 %v151_v4  ;;  %1473 = vmatmul.mubr.f32.gmra.mrb[2].mxu1 %v159_v42  ;;  %v282_v50 = vmul.f32 %v1615_v40, %v2071_v29  ;;  %v1617_v63 = vpop.eup %1616 }
 0x111   :  { %1626 = vrsqrt.f32 %v256_v19  ;;  %316 = vadd.xlane.f32.xlu1 %v296_v46  ;;  %1463 = vmatprep.mubr.f32.mxu0 %v152_v48  ;;  %v299_v14 = vmul.f32 %v283_v0, %v155_v20  ;;  %v243_v25 = vpop.xlane.xlu1 %242  ;;  %v163_v29 = vmul.f32 %v1617_v63, %v2034_v62 }
 0x112   :  { %1628 = vrsqrt.f32 %v257_v1  ;;  %v241_v26 = vpop.xlane.xlu0 %240  ;;  %v1619_v21 = vpop.eup %1618  ;;  %1475 = vmatprep.mubr.f32.mxu1 %v160_v24  ;;  %v298_v59 = vmul.f32 %v282_v50, %v154_v23  ;;  %v259_v57 = vmax.f32 %v243_v25, 1e-24 }
 0x113   :  { %v258_v56 = vmax.f32 %v241_v26, 1e-24  ;;  %v1621_v6 = vpop.eup %1620  ;;  %322 = vadd.xlane.f32.xlu0 %v299_v14  ;;  %v285_v54 = vmul.f32 %v1619_v21, %v2077_v36 }
 0x114   :  { %1464 = vmatmul.mubr.f32.gmra.mrb[4].mxu0 %v153_v9  ;;  %1476 = vmatmul.mubr.f32.gmra.mrb[4].mxu1 %v161_v52  ;;  %v284_v3 = vmul.f32 %v1621_v6, %v2079_v37 }
 0x115   :  { %1630 = vrsqrt.f32 %v258_v56  ;;  %320 = vadd.xlane.f32.xlu1 %v298_v59  ;;  %1466 = vmatprep.mubr.f32.mxu0 %v154_v23  ;;  %v301_v34 = vmul.f32 %v285_v54, %v2206_v18 }
 0x116   :  { %1632 = vrsqrt.f32 %v259_v57  ;;  %v1623_v16 = vpop.eup %1622  ;;  %1478 = vmatprep.mubr.f32.mxu1 %v162_v28  ;;  %v300_v58 = vmul.f32 %v284_v3, %v2178_v61 }
 0x117   :  { %v1625_v4 = vpop.eup %1624  ;;  %326 = vadd.xlane.f32.xlu0 %v301_v34  ;;  %v287_v36 = vmul.f32 %v1623_v16, %v2085_v44 }
 0x118   :  { %1467 = vmatmul.mubr.f32.gmra.mrb[6].mxu0 %v155_v20  ;;  %1479 = vmatmul.mubr.f32.gmra.mrb[6].mxu1 %v163_v29  ;;  %v286_v8 = vmul.f32 %v1625_v4, %v2087_v45  ;;  %v2847_v45 = vld [vmem:[#allocation15_spill] sm:$0xff] }
 0x119   :  { %324 = vadd.xlane.f32.xlu1 %v300_v58  ;;  %v303_v62 = vmul.f32 %v287_v36, %v159_v42  ;;  %v2251_v48 = vpop.permute.xlu0 %721 }
 0x11a   :  { %v302_v17 = vmul.f32 %v286_v8, %v2210_v43  ;;  %v2239_v43 = vpop.permute.xlu1 %724 }
 0x11b   :  { %v1627_v37 = vpop.eup %1626  ;;  %330 = vadd.xlane.f32.xlu0 %v303_v62 }
 0x11c   :  { %v1629_v10 = vpop.eup %1628  ;;  %v288_v5 = vmul.f32 %v1627_v37, %v2844_v2  ;;  %v2293_v2 = vld [vmem:[%s2809_s4] ss:$0 sm:$0xff] }
 0x11d   :  { %v289_v7 = vmul.f32 %v1629_v10, %v2845_v53  ;;  %328 = vadd.xlane.f32.xlu1 %v302_v17  ;;  %v2255_v15 = vpop.permute.xlu0 %748  ;;  %v694_v17 = vlaneseq  ;;  %vm768_vm1 = vcmp.ne.s32.totalorder %v2293_v2, %v2251_v48  ;;  %vm769_vm2 = vcmp.ne.s32.totalorder %v2293_v2, %v2239_v43 }
 0x11e   :  { %v304_v61 = vmul.f32 %v288_v5, %v160_v24  ;;  %v2241_v9 = vpop.permute.xlu1 %727  ;;  %vm777_vm4 = vcmp.ne.s32.totalorder %v2293_v2, %v2255_v15 }
 0x11f   :  { %v1631_v35 = vpop.eup %1630  ;;  %v305_v18 = vmul.f32 %v289_v7, %v161_v52  ;;  %v2288_v10 = vand.u32 127, %v694_v17  ;;  %vm770_vm11 = vcmp.ne.s32.totalorder %v2293_v2, %v2241_v9 }
 0x120   :  { %v1633_v44 = vpop.eup %1632  ;;  %v290_v31 = vmul.f32 %v1631_v35, %v2846_v47 }
 0x121   :  { %334 = vadd.xlane.f32.xlu0 %v305_v18  ;;  %v291_v30 = vmul.f32 %v1633_v44, %v2847_v45  ;;  %332 = vadd.xlane.f32.xlu1 %v304_v61  ;;  %v2259_v42 = vpop.permute.xlu0 %754  ;;  %vm2820_vm3 = vcmp.lt.s32.totalorder %v2288_v10, 8 }
 0x122   :  { %v306_v22 = vmul.f32 %v290_v31, %v162_v28  ;;  %v2243_v41 = vpop.permute.xlu1 %730  ;;  %vm2306_vm5 = vmand %vm768_vm1, %vm2820_vm3  ;;  %vm779_vm13 = vcmp.ne.s32.totalorder %v2293_v2, %v2259_v42 }
 0x123   :  { %v307_v32 = vmul.f32 %v291_v30, %v163_v29  ;;  %vm2314_vm6 = vmand %vm769_vm2, %vm2820_vm3  ;;  %vm771_vm9 = vcmp.ne.s32.totalorder %v2293_v2, %v2243_v41 }
 0x124   :  { %vm2335_vm8 = vmand %vm777_vm4, %vm2820_vm3 }
 0x125   :  { %338 = vadd.xlane.f32.xlu0 %v307_v32  ;;  %336 = vadd.xlane.f32.xlu1 %v306_v22  ;;  %v2263_v55 = vpop.permute.xlu0 %760  ;;  %vm2361_vm12 = vmand %vm771_vm9, %vm2820_vm3 }
 0x126   :  { %v2245_v12 = vpop.permute.xlu1 %733  ;;  %vm2374_vm14 = vmand %vm770_vm11, %vm2820_vm3  ;;  %vm781_vm11 = vcmp.ne.s32.totalorder %v2293_v2, %v2263_v55 }
 0x127   :  { %vm2387_vm1 = vmand %vm779_vm13, %vm2820_vm3 }
 0x129   :  { %v2267_v13 = vpop.permute.xlu0 %766 }
 0x12a   :  { %v2247_v39 = vpop.permute.xlu1 %736 }
 0x12b   :  { %vm773_vm2 = vcmp.ne.s32.totalorder %v2293_v2, %v2247_v39 }
 0x12c   :  { %vm2413_vm9 = vmand %vm773_vm2, %vm2820_vm3 }
 0x12d   :  { %vm2439_vm2 = vmand %vm781_vm11, %vm2820_vm3 }
 0x12e   :  { %v2249_v60 = vpop.permute.xlu1 %739 }
 0x12f   :  { %vm774_vm11 = vcmp.ne.s32.totalorder %v2293_v2, %v2249_v60 }
 0x132   :  { %v2253_v38 = vpop.permute.xlu1 %742 }
 0x136   :  { %v2257_v33 = vpop.permute.xlu1 %745 }
 0x137   :  { %vm776_vm7 = vcmp.ne.s32.totalorder %v2293_v2, %v2257_v33 }
 0x138   :  { %vm2348_vm10 = vmand %vm776_vm7, %vm2820_vm3  ;;  %vm772_vm7 = vcmp.ne.s32.totalorder %v2293_v2, %v2245_v12 }
 0x139   :  { %vm2426_vm13 = vmand %vm772_vm7, %vm2820_vm3  ;;  %vm775_vm7 = vcmp.ne.s32.totalorder %v2293_v2, %v2253_v38 }
 0x13a   :  { %v2261_v27 = vpop.permute.xlu1 %751 }
 0x13b   :  { %vm778_vm15 = vcmp.ne.s32.totalorder %v2293_v2, %v2261_v27 }
 0x13c   :  { %vm2400_vm4 = vmand %vm778_vm15, %vm2820_vm3 }
 0x13e   :  { %v2265_v49 = vpop.permute.xlu1 %757 }
 0x13f   :  { %vm780_vm15 = vcmp.ne.s32.totalorder %v2293_v2, %v2265_v49 }
 0x142   :  { %v2269_v51 = vpop.permute.xlu1 %763 }
 0x194   :  { %v311_v24 = vpop.xlane.xlu0 %310 }
 0x195   :  { %v309_v20 = vpop.xlane.xlu1 %308  ;;  %v341_v11 = vmul.f32 10.0, %v311_v24 }
 0x196   :  { %v340_v19 = vmul.f32 10.0, %v309_v20 }
 0x197   :  { %374 = vst.msk [vmem:[#allocation4 + $0x8] sm:$0xff] %vm2815_vm0, %v341_v11 }
 0x198   :  { %357 = vst.msk [vmem:[#allocation3] sm:$0xff] %vm2815_vm0, %v340_v19  ;;  %373 = vst.msk [vmem:[#allocation4] sm:$0xff] %vm2815_vm0, %v340_v19  ;;  %v315_v1 = vpop.xlane.xlu0 %314 }
 0x199   :  { %v343_v46 = vmul.f32 10.0, %v315_v1 }
 0x19a   :  { %v313_v23 = vpop.xlane.xlu1 %312 }
 0x19b   :  { %v342_v40 = vmul.f32 10.0, %v313_v23  ;;  %376 = vst.msk [vmem:[#allocation4 + $0x18] sm:$0xff] %vm2815_vm0, %v343_v46 }
 0x19c   :  { %v319_v0 = vpop.xlane.xlu0 %318 }
 0x19d   :  { %375 = vst.msk [vmem:[#allocation4 + $0x10] sm:$0xff] %vm2815_vm0, %v342_v40  ;;  %v345_v52 = vmul.f32 10.0, %v319_v0  ;;  %v2856_v0 = vmov 0 }
 0x19e   :  { %v317_v50 = vpop.xlane.xlu1 %316  ;;  %v2857_v0 = vsel %vm2361_vm12, 4294967295, %v2856_v0 }
 0x19f   :  { %v344_v63 = vmul.f32 10.0, %v317_v50  ;;  %378 = vst.msk [vmem:[#allocation4 + $0x28] sm:$0xff] %vm2815_vm0, %v345_v52 }
 0x1a0   :  { %v323_v14 = vpop.xlane.xlu0 %322 }
 0x1a1   :  { %377 = vst.msk [vmem:[#allocation4 + $0x20] sm:$0xff] %vm2815_vm0, %v344_v63  ;;  %v347_v26 = vmul.f32 10.0, %v323_v14 }
 0x1a2   :  { %v321_v25 = vpop.xlane.xlu1 %320 }
 0x1a3   :  { %v346_v21 = vmul.f32 10.0, %v321_v25  ;;  %380 = vst.msk [vmem:[#allocation4 + $0x38] sm:$0xff] %vm2815_vm0, %v347_v26 }
 0x1a4   :  { %v327_v59 = vpop.xlane.xlu0 %326 }
 0x1a5   :  { %379 = vst.msk [vmem:[#allocation4 + $0x30] sm:$0xff] %vm2815_vm0, %v346_v21  ;;  %v349_v56 = vmul.f32 10.0, %v327_v59  ;;  %v2860_v59 = vmov 0 }
 0x1a6   :  { %v325_v28 = vpop.xlane.xlu1 %324  ;;  %v2861_v59 = vsel %vm2387_vm1, 4294967295, %v2860_v59 }
 0x1a7   :  { %v348_v57 = vmul.f32 10.0, %v325_v28  ;;  %382 = vst.msk [vmem:[#allocation4 + $0x48] sm:$0xff] %vm2815_vm0, %v349_v56  ;;  %v2862_v28 = vmov 0 }
 0x1a8   :  { %v331_v6 = vpop.xlane.xlu0 %330  ;;  %v2863_v28 = vsel %vm2400_vm4, 4294967295, %v2862_v28 }
 0x1a9   :  { %381 = vst.msk [vmem:[#allocation4 + $0x40] sm:$0xff] %vm2815_vm0, %v348_v57  ;;  %v351_v54 = vmul.f32 10.0, %v331_v6  ;;  %v2864_v6 = vmov 0 }
 0x1aa   :  { %v329_v29 = vpop.xlane.xlu1 %328  ;;  %v2865_v6 = vsel %vm2413_vm9, 4294967295, %v2864_v6 }
 0x1ab   :  { %v350_v3 = vmul.f32 10.0, %v329_v29  ;;  %384 = vst.msk [vmem:[#allocation4 + $0x58] sm:$0xff] %vm2815_vm0, %v351_v54  ;;  %v2866_v29 = vmov 0 }
 0x1ac   :  { %v2867_v29 = vsel %vm2426_vm13, 4294967295, %v2866_v29 }
 0x1ad   :  { %383 = vst.msk [vmem:[#allocation4 + $0x50] sm:$0xff] %vm2815_vm0, %v350_v3 }
 0x1ae   :  { %v335_v34 = vpop.xlane.xlu0 %334  ;;  %v333_v16 = vpop.xlane.xlu1 %332 }
 0x1af   :  { %v353_v58 = vmul.f32 10.0, %v335_v34  ;;  %v352_v4 = vmul.f32 10.0, %v333_v16  ;;  %v2868_v34 = vmov 0 }
 0x1b0   :  { %v2869_v34 = vsel %vm2439_vm2, 4294967295, %v2868_v34 }
 0x1b1   :  { %386 = vst.msk [vmem:[#allocation4 + $0x68] sm:$0xff] %vm2815_vm0, %v353_v58  ;;  %385 = vst.msk [vmem:[#allocation4 + $0x60] sm:$0xff] %vm2815_vm0, %v352_v4  ;;  %v2870_v58 = vmov 0 }
 0x1b2   :  { %v339_v36 = vpop.xlane.xlu0 %338  ;;  %v337_v8 = vpop.xlane.xlu1 %336 }
 0x1b3   :  { %v355_v62 = vmul.f32 10.0, %v339_v36  ;;  %v354_v37 = vmul.f32 10.0, %v337_v8  ;;  %v2872_v36 = vmov 0 }
 0x1b5   :  { %388 = vst.msk [vmem:[#allocation4 + $0x78] sm:$0xff] %vm2815_vm0, %v355_v62  ;;  %387 = vst.msk [vmem:[#allocation4 + $0x70] sm:$0xff] %vm2815_vm0, %v354_v37  ;;  %v2874_v62 = vmov 0 }
 0x1b6   :  { %vm2452_vm0 = vmand %vm780_vm15, %vm2820_vm3  ;;  %vm2876_vm15 = vcmask 7168  }
 0x1b7   :  { %v2871_v58 = vsel %vm2452_vm0, 4294967295, %v2870_v58 }
 0x1df   :  { %v1459_v5 = vpop.f32.mrb[0].mxu0  ;;  %v1471_v53 = vpop.f32.mrb[0].mxu1 }
 0x1e0   :  { %v2302_v7 = vmul.f32 10.0, %v1459_v5  ;;  %v599_v61 = vpop.f32.mrb[1].mxu0  ;;  %v639_v35 = vpop.f32.mrb[1].mxu1  ;;  %v2318_v31 = vmul.f32 10.0, %v1471_v53  ;;  %v1754_v5 = vmov 1.0  }
 0x1e1   :  { %v2310_v44 = vmul.f32 10.0, %v599_v61  ;;  %v2325_v30 = vmul.f32 10.0, %v639_v35  ;;  %390 = vst.msk [vmem:[#allocation5 + $0x8] sm:$0xff] %vm2876_vm15, %v1754_v5 }
 0x1e2   :  { %v820_v45 = vsel %vm2314_vm6, %v2302_v7, -1e+30  ;;  %v828_v11 = vsel %vm2335_vm8, %v2318_v31, -1e+30 }
 0x1e3   :  { %v1462_v22 = vpop.f32.mrb[2].mxu0  ;;  %v1474_v32 = vpop.f32.mrb[2].mxu1  ;;  %837 = vmax.xlane.f32.xlu1 %v820_v45  ;;  %v819_v43 = vsel %vm2306_vm5, %v2310_v44, -1e+30  ;;  %v827_v41 = vsel %vm2348_vm10, %v2325_v30, -1e+30 }
 0x1e4   :  { %v609_v24 = vpop.f32.mrb[3].mxu0  ;;  %v649_v33 = vpop.f32.mrb[3].mxu1  ;;  %835 = vmax.xlane.f32.xlu0 %v819_v43  ;;  %v2341_v20 = vmul.f32 10.0, %v1462_v22  ;;  %v2367_v9 = vmul.f32 10.0, %v1474_v32  ;;  %v2529_v22 = vld [vmem:[#allocation4 + $0x8] sm:$0xff] }
 0x1e5   :  { %v2354_v19 = vmul.f32 10.0, %v609_v24  ;;  %v2380_v63 = vmul.f32 10.0, %v649_v33 }
 0x1e6   :  { %v822_v52 = vsel %vm2361_vm12, %v2341_v20, -1e+30  ;;  %v830_v56 = vsel %vm2387_vm1, %v2367_v9, -1e+30 }
 0x1e7   :  { %v1465_v1 = vpop.f32.mrb[4].mxu0  ;;  %v1477_v46 = vpop.f32.mrb[4].mxu1  ;;  %853 = vmax.xlane.f32.xlu1 %v828_v11  ;;  %v821_v42 = vsel %vm2374_vm14, %v2354_v19, -1e+30  ;;  %v829_v39 = vsel %vm2400_vm4, %v2380_v63, -1e+30 }
 0x1e8   :  { %v619_v23 = vpop.f32.mrb[5].mxu0  ;;  %v659_v40 = vpop.f32.mrb[5].mxu1  ;;  %851 = vmax.xlane.f32.xlu0 %v827_v41  ;;  %v2393_v27 = vmul.f32 10.0, %v1465_v1  ;;  %v2419_v54 = vmul.f32 10.0, %v1477_v46  ;;  %v2548_v11 = vld [vmem:[#allocation4 + $0x48] sm:$0xff]  ;;  %v2554_v46 = vld [vmem:[#allocation4 + $0x40] sm:$0xff] }
 0x1e9   :  { %v2406_v57 = vmul.f32 10.0, %v619_v23  ;;  %v2432_v3 = vmul.f32 10.0, %v659_v40  ;;  %v2647_v40 = vld [vmem:[#allocation4 + $0x38] sm:$0xff] }
 0x1ea   :  { %v824_v12 = vsel %vm2413_vm9, %v2393_v27, -1e+30  ;;  %v832_v49 = vsel %vm2439_vm2, %v2419_v54, -1e+30  ;;  %vm2465_vm2 = vmand %vm775_vm7, %vm2820_vm3  ;;  %2915 = vst [vmem:[#allocation18_spill] sm:$0xff] %v2647_v40 }
 0x1eb   :  { %v1468_v14 = vpop.f32.mrb[6].mxu0  ;;  %v1480_v26 = vpop.f32.mrb[6].mxu1  ;;  %841 = vmax.xlane.f32.xlu1 %v822_v52  ;;  %v823_v55 = vsel %vm2426_vm13, %v2406_v57, -1e+30  ;;  %v831_v38 = vsel %vm2452_vm0, %v2432_v3, -1e+30  ;;  %vm2478_vm9 = vmand %vm774_vm11, %vm2820_vm3 }
 0x1ec   :  { %v629_v25 = vpop.f32.mrb[7].mxu0  ;;  %v669_v21 = vpop.f32.mrb[7].mxu1  ;;  %839 = vmax.xlane.f32.xlu0 %v821_v42  ;;  %v2445_v16 = vmul.f32 10.0, %v1468_v14  ;;  %v2873_v36 = vsel %vm2465_vm2, 4294967295, %v2872_v36  ;;  %v2471_v8 = vmul.f32 10.0, %v1480_v26  ;;  %v2875_v62 = vsel %vm2478_vm9, 4294967295, %v2874_v62 }
 0x1ed   :  { %v2458_v4 = vmul.f32 10.0, %v629_v25  ;;  %v2484_v37 = vmul.f32 10.0, %v669_v21  ;;  %v2567_v26 = vld [vmem:[#allocation4 + $0x18] sm:$0xff]  ;;  %v2574_v25 = vld [vmem:[#allocation4 + $0x10] sm:$0xff] }
 0x1ee   :  { %v826_v60 = vsel %vm2465_vm2, %v2445_v16, -1e+30  ;;  %vm2877_vm2 = vmmov %vm2876_vm15 }
 0x1ef   :  { %857 = vmax.xlane.f32.xlu1 %v830_v56  ;;  %v825_v17 = vsel %vm2478_vm9, %v2458_v4, -1e+30  ;;  %389 = vst.msk [vmem:[#allocation5] sm:$0xff] %vm2877_vm2, %v1754_v5  ;;  %vm2878_vm0 = vmmov %vm2877_vm2 }
 0x1f0   :  { %855 = vmax.xlane.f32.xlu0 %v829_v39  ;;  %391 = vst.msk [vmem:[#allocation5 + $0x10] sm:$0xff] %vm2878_vm0, %v1754_v5  ;;  %vm2879_vm11 = vmmov %vm2878_vm0 }
 0x1f1   :  { %392 = vst.msk [vmem:[#allocation5 + $0x18] sm:$0xff] %vm2879_vm11, %v1754_v5  ;;  %vm2880_vm3 = vmmov %vm2878_vm0 }
 0x1f2   :  { %393 = vst.msk [vmem:[#allocation5 + $0x20] sm:$0xff] %vm2880_vm3, %v1754_v5  ;;  %vm2881_vm13 = vmmov %vm2878_vm0 }
 0x1f3   :  { %845 = vmax.xlane.f32.xlu1 %v824_v12  ;;  %394 = vst.msk [vmem:[#allocation5 + $0x28] sm:$0xff] %vm2881_vm13, %v1754_v5  ;;  %vm2882_vm7 = vmmov %vm2878_vm0  ;;  %vm2891_vm13 = vcmp.lt.s32.totalorder %v2288_v10, 8  ;;  %v2534_v10 = vld [vmem:[#allocation4] sm:$0xff]  ;;  %v2674_v12 = vld [vmem:[#allocation4 + $0x70] sm:$0xff] }
 0x1f4   :  { %843 = vmax.xlane.f32.xlu0 %v823_v55  ;;  %395 = vst.msk [vmem:[#allocation5 + $0x30] sm:$0xff] %vm2882_vm7, %v1754_v5  ;;  %vm2883_vm1 = vmmov %vm2878_vm0 }
 0x1f5   :  { %396 = vst.msk [vmem:[#allocation5 + $0x38] sm:$0xff] %vm2883_vm1, %v1754_v5  ;;  %vm2884_vm4 = vmmov %vm2878_vm0  ;;  %vm2892_vm1 = vcmp.ne.s32.totalorder %v2293_v2, %v2267_v13 }
 0x1f6   :  { %397 = vst.msk [vmem:[#allocation5 + $0x40] sm:$0xff] %vm2884_vm4, %v1754_v5  ;;  %vm2885_vm9 = vmmov %vm2878_vm0 }
 0x1f7   :  { %861 = vmax.xlane.f32.xlu1 %v832_v49  ;;  %398 = vst.msk [vmem:[#allocation5 + $0x48] sm:$0xff] %vm2885_vm9, %v1754_v5  ;;  %vm2886_vm12 = vmmov %vm2878_vm0  ;;  %vm2896_vm9 = vcmp.ne.s32.totalorder %v2293_v2, %v2269_v51  ;;  %v2587_v49 = vld [vmem:[#allocation4 + $0x58] sm:$0xff] }
 0x1f8   :  { %859 = vmax.xlane.f32.xlu0 %v831_v38  ;;  %399 = vst.msk [vmem:[#allocation5 + $0x50] sm:$0xff] %vm2886_vm12, %v1754_v5  ;;  %vm2887_vm15 = vmmov %vm2878_vm0 }
 0x1f9   :  { %400 = vst.msk [vmem:[#allocation5 + $0x58] sm:$0xff] %vm2887_vm15, %v1754_v5  ;;  %vm2888_vm2 = vmmov %vm2878_vm0 }
 0x1fa   :  { %401 = vst.msk [vmem:[#allocation5 + $0x60] sm:$0xff] %vm2888_vm2, %v1754_v5  ;;  %vm2889_vm11 = vmmov %vm2878_vm0 }
 0x1fb   :  { %849 = vmax.xlane.f32.xlu1 %v826_v60  ;;  %402 = vst.msk [vmem:[#allocation5 + $0x68] sm:$0xff] %vm2878_vm0, %v1754_v5  ;;  %vm2890_vm3 = vmmov %vm2878_vm0  ;;  %v2594_v60 = vld [vmem:[#allocation4 + $0x50] sm:$0xff] }
 0x1fc   :  { %403 = vst.msk [vmem:[#allocation5 + $0x70] sm:$0xff] %vm2889_vm11, %v1754_v5  ;;  %847 = vmax.xlane.f32.xlu0 %v825_v17  ;;  %vm2510_vm4 = vmand %vm2892_vm1, %vm2891_vm13 }
 0x1fd   :  { %404 = vst.msk [vmem:[#allocation5 + $0x78] sm:$0xff] %vm2890_vm3, %v1754_v5  ;;  %v834_v61 = vsel %vm2510_vm4, %v2471_v8, -1e+30  ;;  %vm2895_vm12 = vmmov %vm2891_vm13 }
 0x1fe   :  { %vm2522_vm7 = vmand %vm2896_vm9, %vm2895_vm12  ;;  %2923 = vst [vmem:[#allocation24_spill] sm:$0xff] %v2674_v12 }
 0x1ff   :  { %865 = vmax.xlane.f32.xlu1 %v834_v61  ;;  %v833_v13 = vsel %vm2522_vm7, %v2484_v37, -1e+30  ;;  %vm2899_vm15 = vmmov %vm2878_vm0  ;;  %v2627_v61 = vld [vmem:[#allocation4 + $0x68] sm:$0xff] }
 0x200   :  { %863 = vmax.xlane.f32.xlu0 %v833_v13  ;;  %vm2900_vm2 = vmmov %vm2878_vm0  ;;  %2910 = vst [vmem:[#allocation14_spill] sm:$0xff] %v2627_v61 }
 0x201   :  { %vm2901_vm11 = vmmov %vm2878_vm0 }
 0x202   :  { %vm2902_vm3 = vmmov %vm2878_vm0 }
 0x203   :  { %vm2903_vm13 = vmmov %vm2878_vm0 }
 0x204   :  { %vm2904_vm1 = vmmov %vm2878_vm0 }
 0x205   :  { %vm2905_vm12 = vmmov %vm2878_vm0 }
 0x206   :  { %vm2908_vm9 = vmmov %vm2878_vm0 }
 0x270   :  { %v838_v45 = vpop.xlane.xlu1 %837 }
 0x271   :  { %v2532_v32 = vmax.f32 %v2529_v22, %v838_v45  ;;  %v836_v43 = vpop.xlane.xlu0 %835 }
 0x272   :  { %v2537_v51 = vmax.f32 %v2534_v10, %v836_v43  ;;  %v2607_v43 = vld [vmem:[#allocation4 + $0x28] sm:$0xff] }
 0x273   :  { %1173 = vst.msk [vmem:[#allocation4 + $0x8] sm:$0xff] %vm2899_vm15, %v2532_v32  ;;  %890 = vperm.xlu1 %1537, %v2532_v32   ;;  %2906 = vst [vmem:[#allocation12_spill] sm:$0xff] %v2607_v43 }
 0x274   :  { %1172 = vst.msk [vmem:[#allocation4] sm:$0xff] %vm2900_vm2, %v2537_v51  ;;  %v854_v33 = vpop.xlane.xlu1 %853  ;;  %885 = vperm.xlu0 %1536, %v2537_v51   ;;  %vm2909_vm15 = vmmov %vm2878_vm0 }
 0x275   :  { %v2552_v1 = vmax.f32 %v2548_v11, %v854_v33  ;;  %v852_v41 = vpop.xlane.xlu0 %851  ;;  %vm2914_vm2 = vmmov %vm2878_vm0 }
 0x276   :  { %v2557_v23 = vmax.f32 %v2554_v46, %v852_v41  ;;  %v2614_v41 = vld [vmem:[#allocation4 + $0x20] sm:$0xff] }
 0x277   :  { %1181 = vst.msk [vmem:[#allocation4 + $0x48] sm:$0xff] %vm2878_vm0, %v2552_v1 }
 0x278   :  { %1180 = vst.msk [vmem:[#allocation4 + $0x40] sm:$0xff] %vm2901_vm11, %v2557_v23  ;;  %v842_v14 = vpop.xlane.xlu1 %841  ;;  %930 = vperm.xlu0 %1536, %v2552_v1   ;;  %925 = vperm.xlu1 %1537, %v2557_v23   ;;  %vm2919_vm11 = vmmov %vm2878_vm0 }
 0x279   :  { %v2572_v42 = vmax.f32 %v2567_v26, %v842_v14  ;;  %v840_v21 = vpop.xlane.xlu0 %839 }
 0x27a   :  { %v2577_v56 = vmax.f32 %v2574_v25, %v840_v21 }
 0x27b   :  { %1175 = vst.msk [vmem:[#allocation4 + $0x18] sm:$0xff] %vm2902_vm3, %v2572_v42  ;;  %vm2920_vm3 = vmmov %vm2878_vm0 }
 0x27c   :  { %1174 = vst.msk [vmem:[#allocation4 + $0x10] sm:$0xff] %vm2903_vm13, %v2577_v56  ;;  %v858_v55 = vpop.xlane.xlu1 %857  ;;  %900 = vperm.xlu0 %1536, %v2572_v42   ;;  %895 = vperm.xlu1 %1537, %v2577_v56   ;;  %vm2925_vm13 = vmmov %vm2878_vm0 }
 0x27d   :  { %v2592_v38 = vmax.f32 %v2587_v49, %v858_v55  ;;  %v856_v17 = vpop.xlane.xlu0 %855  ;;  %v2634_v55 = vld [vmem:[#allocation4 + $0x60] sm:$0xff] }
 0x27e   :  { %v2597_v5 = vmax.f32 %v2594_v60, %v856_v17  ;;  %2912 = vst [vmem:[#allocation16_spill] sm:$0xff] %v2634_v55  ;;  %v2654_v17 = vld [vmem:[#allocation4 + $0x30] sm:$0xff] }
 0x27f   :  { %1183 = vst.msk [vmem:[#allocation4 + $0x58] sm:$0xff] %vm2904_vm1, %v2592_v38  ;;  %2917 = vst [vmem:[#allocation20_spill] sm:$0xff] %v2654_v17 }
 0x280   :  { %1182 = vst.msk [vmem:[#allocation4 + $0x50] sm:$0xff] %vm2905_vm12, %v2597_v5  ;;  %v846_v45 = vpop.xlane.xlu1 %845  ;;  %940 = vperm.xlu0 %1536, %v2592_v38   ;;  %935 = vperm.xlu1 %1537, %v2597_v5   ;;  %vm2926_vm1 = vmmov %vm2878_vm0  ;;  %vm2932_vm12 = vnez %v2871_v58 }
 0x281   :  { %v2612_v33 = vmax.f32 %v2607_v43, %v846_v45  ;;  %v844_v14 = vpop.xlane.xlu0 %843 }
 0x282   :  { %v2617_v21 = vmax.f32 %v2614_v41, %v844_v14 }
 0x283   :  { %2907 = vst [vmem:[#allocation13_spill] sm:$0xff] %v2612_v33  ;;  %1177 = vst.msk [vmem:[#allocation4 + $0x28] sm:$0xff] %vm2908_vm9, %v2612_v33  ;;  %vm2933_vm9 = vnez %v2869_v34 }
 0x284   :  { %1176 = vst.msk [vmem:[#allocation4 + $0x20] sm:$0xff] %vm2909_vm15, %v2617_v21  ;;  %v862_v45 = vpop.xlane.xlu1 %861  ;;  %910 = vperm.xlu0 %1536, %v2612_v33   ;;  %905 = vperm.xlu1 %1537, %v2617_v21   ;;  %vm2934_vm15 = vnez %v2875_v62 }
 0x285   :  { %v2632_v14 = vmax.f32 %v2627_v61, %v862_v45  ;;  %v860_v13 = vpop.xlane.xlu0 %859 }
 0x286   :  { %v2637_v39 = vmax.f32 %v2634_v55, %v860_v13 }
 0x287   :  { %2911 = vst [vmem:[#allocation15_spill] sm:$0xff] %v2632_v14  ;;  %1185 = vst.msk [vmem:[#allocation4 + $0x68] sm:$0xff] %vm2914_vm2, %v2632_v14  ;;  %vm2935_vm2 = vnez %v2873_v36 }
 0x288   :  { %2913 = vst [vmem:[#allocation17_spill] sm:$0xff] %v2637_v39  ;;  %1184 = vst.msk [vmem:[#allocation4 + $0x60] sm:$0xff] %vm2878_vm0, %v2637_v39  ;;  %v850_v45 = vpop.xlane.xlu1 %849  ;;  %950 = vperm.xlu0 %1536, %v2632_v14   ;;  %945 = vperm.xlu1 %1537, %v2637_v39   ;;  %v2667_v14 = vld [vmem:[#allocation4 + $0x78] sm:$0xff] }
 0x289   :  { %v2652_v13 = vmax.f32 %v2647_v40, %v850_v45  ;;  %v848_v52 = vpop.xlane.xlu0 %847  ;;  %2921 = vst [vmem:[#allocation22_spill] sm:$0xff] %v2667_v14 }
 0x28a   :  { %v2657_v24 = vmax.f32 %v2654_v17, %v848_v52 }
 0x28b   :  { %2916 = vst [vmem:[#allocation19_spill] sm:$0xff] %v2652_v13  ;;  %1179 = vst.msk [vmem:[#allocation4 + $0x38] sm:$0xff] %vm2919_vm11, %v2652_v13 }
 0x28c   :  { %2918 = vst [vmem:[#allocation21_spill] sm:$0xff] %v2657_v24  ;;  %1178 = vst.msk [vmem:[#allocation4 + $0x30] sm:$0xff] %vm2920_vm3, %v2657_v24  ;;  %v866_v45 = vpop.xlane.xlu1 %865  ;;  %920 = vperm.xlu0 %1536, %v2652_v13   ;;  %915 = vperm.xlu1 %1537, %v2657_v24  }
 0x28d   :  { %v2672_v52 = vmax.f32 %v2667_v14, %v866_v45  ;;  %v864_v40 = vpop.xlane.xlu0 %863  ;;  %vm2962_vm11 = vmmov %vm2878_vm0 }
 0x28e   :  { %v2677_v61 = vmax.f32 %v2674_v12, %v864_v40  ;;  %vm2969_vm3 = vmmov %vm2878_vm0 }
 0x28f   :  { %2922 = vst [vmem:[#allocation23_spill] sm:$0xff] %v2672_v52  ;;  %1187 = vst.msk [vmem:[#allocation4 + $0x78] sm:$0xff] %vm2925_vm13, %v2672_v52 }
 0x290   :  { %2924 = vst [vmem:[#allocation25_spill] sm:$0xff] %v2677_v61  ;;  %1186 = vst.msk [vmem:[#allocation4 + $0x70] sm:$0xff] %vm2926_vm1, %v2677_v61  ;;  %960 = vperm.xlu0 %1536, %v2672_v52   ;;  %955 = vperm.xlu1 %1537, %v2677_v61  }
 0x291   :  { %vm2970_vm13 = vmmov %vm2878_vm0 }
 0x292   :  { %vm2971_vm1 = vmmov %vm2878_vm0 }
 0x2f2   :  { %v891_v45 = vpop.permute.xlu1 %890 }
 0x2f3   :  { %v964_v40 = vsub.f32 %v2302_v7, %v891_v45  ;;  %v886_v24 = vpop.permute.xlu0 %885 }
 0x2f4   :  { %v963_v13 = vsub.f32 %v2310_v44, %v886_v24 }
 0x2f5   :  { %v981_v2 = vmul.f32 1.442695, %v964_v40 }
 0x2f6   :  { %v979_v14 = vmul.f32 1.442695, %v963_v13 }
 0x2f7   :  { %1634 = vpow2.f32 %v981_v2  ;;  %v926_v39 = vpop.permute.xlu1 %925  ;;  %v931_v55 = vpop.permute.xlu0 %930 }
 0x2f8   :  { %1636 = vpow2.f32 %v979_v14  ;;  %v971_v17 = vsub.f32 %v2325_v30, %v926_v39  ;;  %v972_v12 = vsub.f32 %v2318_v31, %v931_v55 }
 0x2fa   :  { %v995_v33 = vmul.f32 1.442695, %v971_v17  ;;  %v997_v52 = vmul.f32 1.442695, %v972_v12 }
 0x2fb   :  { %v896_v43 = vpop.permute.xlu1 %895  ;;  %v901_v61 = vpop.permute.xlu0 %900 }
 0x2fc   :  { %1638 = vpow2.f32 %v995_v33  ;;  %v965_v7 = vsub.f32 %v2354_v19, %v896_v43  ;;  %v966_v45 = vsub.f32 %v2341_v20, %v901_v61 }
 0x2fd   :  { %1640 = vpow2.f32 %v997_v52 }
 0x2fe   :  { %v983_v44 = vmul.f32 1.442695, %v965_v7  ;;  %v985_v24 = vmul.f32 1.442695, %v966_v45 }
 0x2ff   :  { %v936_v2 = vpop.permute.xlu1 %935  ;;  %v941_v13 = vpop.permute.xlu0 %940 }
 0x300   :  { %1642 = vpow2.f32 %v983_v44  ;;  %v973_v14 = vsub.f32 %v2380_v63, %v936_v2  ;;  %v974_v30 = vsub.f32 %v2367_v9, %v941_v13 }
 0x301   :  { %v1635_v31 = vpop.eup %1634  ;;  %1644 = vpow2.f32 %v985_v24 }
 0x302   :  { %v1637_v39 = vpop.eup %1636  ;;  %v999_v12 = vmul.f32 1.442695, %v973_v14  ;;  %v1001_v55 = vmul.f32 1.442695, %v974_v30  ;;  %v1012_v19 = vsel %vm2314_vm6, %v1635_v31, 0.0  ;;  %vm2928_vm6 = vnez %v2863_v28 }
 0x303   :  { %1109 = vadd.xlane.f32.xlu0 %v1012_v19  ;;  %v906_v20 = vpop.permute.xlu1 %905  ;;  %v911_v61 = vpop.permute.xlu0 %910  ;;  %v1011_v43 = vsel %vm2306_vm5, %v1637_v39, 0.0  ;;  %vm2927_vm5 = vnez %v2857_v0 }
 0x304   :  { %1646 = vpow2.f32 %v999_v12  ;;  %v967_v33 = vsub.f32 %v2406_v57, %v906_v20  ;;  %v968_v63 = vsub.f32 %v2393_v27, %v911_v61  ;;  %1107 = vadd.xlane.f32.xlu1 %v1011_v43 }
 0x305   :  { %1648 = vpow2.f32 %v1001_v55 }
 0x306   :  { %v1639_v9 = vpop.eup %1638  ;;  %v987_v17 = vmul.f32 1.442695, %v967_v33  ;;  %v989_v52 = vmul.f32 1.442695, %v968_v63 }
 0x307   :  { %v1641_v40 = vpop.eup %1640  ;;  %v946_v7 = vpop.permute.xlu1 %945  ;;  %v1019_v45 = vsel %vm2348_vm10, %v1639_v9, 0.0  ;;  %vm2930_vm10 = vnez %v2867_v29 }
 0x308   :  { %v951_v47 = vpop.permute.xlu0 %950  ;;  %1650 = vpow2.f32 %v987_v17  ;;  %v975_v18 = vsub.f32 %v2432_v3, %v946_v7  ;;  %1123 = vadd.xlane.f32.xlu0 %v1019_v45  ;;  %v1020_v27 = vsel %vm2335_vm8, %v1641_v40, 0.0  ;;  %vm2929_vm8 = vnez %v2861_v59 }
 0x309   :  { %v976_v44 = vsub.f32 %v2419_v54, %v951_v47  ;;  %1652 = vpow2.f32 %v989_v52  ;;  %1125 = vadd.xlane.f32.xlu1 %v1020_v27  ;;  %v2936_v45 = vsub.f32 %v2529_v22, %v2532_v32  ;;  %v2939_v27 = vsub.f32 %v2548_v11, %v2552_v1 }
 0x30a   :  { %v1643_v57 = vpop.eup %1642  ;;  %v1003_v24 = vmul.f32 1.442695, %v975_v18  ;;  %v2937_v18 = vsub.f32 %v2534_v10, %v2537_v51  ;;  %v2941_v32 = vsub.f32 %v2567_v26, %v2572_v42  ;;  %v2942_v51 = vsub.f32 %v2594_v60, %v2597_v5 }
 0x30b   :  { %v1005_v2 = vmul.f32 1.442695, %v976_v44  ;;  %v1645_v13 = vpop.eup %1644  ;;  %v916_v14 = vpop.permute.xlu1 %915  ;;  %v1013_v15 = vsel %vm2374_vm14, %v1643_v57, 0.0  ;;  %vm2931_vm14 = vnez %v2865_v6  ;;  %v1061_v62 = vmul.f32 1.442695, %v2936_v45 }
 0x30c   :  { %v921_v30 = vpop.permute.xlu0 %920  ;;  %1654 = vpow2.f32 %v1003_v24  ;;  %v969_v3 = vsub.f32 %v2458_v4, %v916_v14  ;;  %1111 = vadd.xlane.f32.xlu0 %v1013_v15  ;;  %v1014_v48 = vsel %vm2927_vm5, %v1645_v13, 0.0  ;;  %v1059_v36 = vmul.f32 1.442695, %v2937_v18  ;;  %v1028_v24 = vld [vmem:[#allocation5 + $0x8] sm:$0xff]  ;;  %v2945_v13 = vld [vmem:[#allocation12_spill] sm:$0xff]  ;;  %v1037_v18 = vld [vmem:[#allocation5 + $0x50] sm:$0xff] }
 0x30d   :  { %v970_v54 = vsub.f32 %v2445_v16, %v921_v30  ;;  %1656 = vpow2.f32 %v1005_v2  ;;  %1113 = vadd.xlane.f32.xlu1 %v1014_v48  ;;  %v2938_v44 = vsub.f32 %v2554_v46, %v2557_v23  ;;  %v1077_v53 = vmul.f32 1.442695, %v2939_v27  ;;  %v2946_v14 = vld [vmem:[#allocation13_spill] sm:$0xff]  ;;  %v1038_v27 = vld [vmem:[#allocation5 + $0x58] sm:$0xff]  ;;  %vm2972_vm5 = vmmov %vm2878_vm0 }
 0x30e   :  { %v1647_v31 = vpop.eup %1646  ;;  %v991_v39 = vmul.f32 1.442695, %v969_v3  ;;  %v2940_v57 = vsub.f32 %v2574_v25, %v2577_v56  ;;  %v1065_v10 = vmul.f32 1.442695, %v2941_v32  ;;  %v1079_v46 = vmul.f32 1.442695, %v2942_v51 }
 0x30f   :  { %v993_v12 = vmul.f32 1.442695, %v970_v54  ;;  %v1649_v55 = vpop.eup %1648  ;;  %v956_v19 = vpop.permute.xlu1 %955  ;;  %v1021_v50 = vsel %vm2928_vm6, %v1647_v31, 0.0  ;;  %v1075_v35 = vmul.f32 1.442695, %v2938_v44  ;;  %v2943_v11 = vsub.f32 %v2587_v49, %v2592_v38  ;;  %v1027_v25 = vld [vmem:[#allocation5] sm:$0xff]  ;;  %vm2973_vm6 = vmmov %vm2878_vm0 }
 0x310   :  { %v961_v20 = vpop.permute.xlu0 %960  ;;  %1658 = vpow2.f32 %v991_v39  ;;  %v977_v4 = vsub.f32 %v2484_v37, %v956_v19  ;;  %1127 = vadd.xlane.f32.xlu0 %v1021_v50  ;;  %v1022_v0 = vsel %vm2929_vm8, %v1649_v55, 0.0  ;;  %v1063_v22 = vmul.f32 1.442695, %v2940_v57  ;;  %v1035_v38 = vld [vmem:[#allocation5 + $0x40] sm:$0xff]  ;;  %v1036_v39 = vld [vmem:[#allocation5 + $0x48] sm:$0xff]  ;;  %v2952_v19 = vld [vmem:[#allocation14_spill] sm:$0xff] }
 0x311   :  { %v978_v16 = vsub.f32 %v2471_v8, %v961_v20  ;;  %1660 = vpow2.f32 %v993_v12  ;;  %1129 = vadd.xlane.f32.xlu1 %v1022_v0  ;;  %v1081_v1 = vmul.f32 1.442695, %v2943_v11  ;;  %v2944_v56 = vsub.f32 %v2614_v41, %v2617_v21  ;;  %v2948_v12 = vld [vmem:[#allocation16_spill] sm:$0xff]  ;;  %v2949_v55 = vld [vmem:[#allocation17_spill] sm:$0xff]  ;;  %v2953_v20 = vld [vmem:[#allocation15_spill] sm:$0xff] }
 0x312   :  { %v1651_v61 = vpop.eup %1650  ;;  %v1007_v43 = vmul.f32 1.442695, %v977_v4  ;;  %v2947_v60 = vsub.f32 %v2945_v13, %v2946_v14  ;;  %v2950_v41 = vsub.f32 %v2948_v12, %v2949_v55  ;;  %v2954_v50 = vsub.f32 %v2952_v19, %v2953_v20  ;;  %v2964_v57 = vld [vmem:[#allocation25_spill] sm:$0xff]  ;;  %vm2974_vm8 = vmmov %vm2878_vm0 }
 0x313   :  { %v1009_v33 = vmul.f32 1.442695, %v978_v16  ;;  %v1653_v63 = vpop.eup %1652  ;;  %v1015_v9 = vsel %vm2930_vm10, %v1651_v61, 0.0  ;;  %v1067_v26 = vmul.f32 1.442695, %v2944_v56  ;;  %vm2975_vm10 = vmmov %vm2878_vm0 }
 0x314   :  { %1662 = vpow2.f32 %v1007_v43  ;;  %1115 = vadd.xlane.f32.xlu0 %v1015_v9  ;;  %v1016_v28 = vsel %vm2931_vm14, %v1653_v63, 0.0  ;;  %v1069_v5 = vmul.f32 1.442695, %v2947_v60  ;;  %v1083_v21 = vmul.f32 1.442695, %v2950_v41  ;;  %v2956_v9 = vld [vmem:[#allocation18_spill] sm:$0xff]  ;;  %vm2976_vm14 = vmmov %vm2878_vm0 }
 0x315   :  { %1664 = vpow2.f32 %v1009_v33  ;;  %1117 = vadd.xlane.f32.xlu1 %v1016_v28  ;;  %v1085_v4 = vmul.f32 1.442695, %v2954_v50  ;;  %v1029_v33 = vld [vmem:[#allocation5 + $0x10] sm:$0xff]  ;;  %v2957_v28 = vld [vmem:[#allocation19_spill] sm:$0xff]  ;;  %v1032_v60 = vld [vmem:[#allocation5 + $0x28] sm:$0xff] }
 0x316   :  { %v1655_v8 = vpop.eup %1654  ;;  %1666 = vpow2.f32 %v1061_v62  ;;  %v1033_v50 = vld [vmem:[#allocation5 + $0x30] sm:$0xff] }
 0x317   :  { %v1657_v37 = vpop.eup %1656  ;;  %v1023_v59 = vsel %vm2932_vm12, %v1655_v8, 0.0  ;;  %1668 = vpow2.f32 %v1059_v36  ;;  %v2958_v8 = vsub.f32 %v2956_v9, %v2957_v28  ;;  %vm2977_vm12 = vmmov %vm2878_vm0 }
 0x318   :  { %1131 = vadd.xlane.f32.xlu0 %v1023_v59  ;;  %v1024_v17 = vsel %vm2933_vm9, %v1657_v37, 0.0  ;;  %1670 = vpow2.f32 %v1075_v35  ;;  %vm2978_vm9 = vmmov %vm2878_vm0 }
 0x319   :  { %1133 = vadd.xlane.f32.xlu1 %v1024_v17  ;;  %1672 = vpow2.f32 %v1077_v53  ;;  %v1073_v37 = vmul.f32 1.442695, %v2958_v8  ;;  %v2963_v53 = vld [vmem:[#allocation24_spill] sm:$0xff] }
 0x31a   :  { %v1659_v52 = vpop.eup %1658  ;;  %1674 = vpow2.f32 %v1063_v22  ;;  %v2965_v22 = vsub.f32 %v2963_v53, %v2964_v57 }
 0x31b   :  { %v1661_v29 = vpop.eup %1660  ;;  %v1017_v40 = vsel %vm2934_vm15, %v1659_v52, 0.0  ;;  %1676 = vpow2.f32 %v1065_v10  ;;  %v1030_v52 = vld [vmem:[#allocation5 + $0x18] sm:$0xff]  ;;  %vm2979_vm15 = vmmov %vm2878_vm0 }
 0x31c   :  { %1119 = vadd.xlane.f32.xlu0 %v1017_v40  ;;  %v1018_v6 = vsel %vm2935_vm2, %v1661_v29, 0.0  ;;  %1678 = vpow2.f32 %v1079_v46  ;;  %v2959_v29 = vld [vmem:[#allocation20_spill] sm:$0xff]  ;;  %v2960_v40 = vld [vmem:[#allocation21_spill] sm:$0xff]  ;;  %v1087_v32 = vmul.f32 1.442695, %v2965_v22  ;;  %v2966_v46 = vld [vmem:[#allocation22_spill] sm:$0xff] }
 0x31d   :  { %1121 = vadd.xlane.f32.xlu1 %v1018_v6  ;;  %1680 = vpow2.f32 %v1081_v1  ;;  %v2961_v6 = vsub.f32 %v2959_v29, %v2960_v40  ;;  %v1271_v29 = vld [vmem:[#allocation3] sm:$0xff]  ;;  %vm2980_vm2 = vmmov %vm2878_vm0 }
 0x31e   :  { %v1663_v7 = vpop.eup %1662  ;;  %1682 = vpow2.f32 %v1067_v26  ;;  %v1031_v26 = vld [vmem:[#allocation5 + $0x20] sm:$0xff] }
 0x31f   :  { %v1665_v47 = vpop.eup %1664  ;;  %v1025_v58 = vsel %vm2522_vm7, %v1663_v7, 0.0  ;;  %1684 = vpow2.f32 %v1069_v5  ;;  %vm2955_vm7 = vmmov %vm2878_vm0  ;;  %v1071_v7 = vmul.f32 1.442695, %v2961_v6 }
 0x320   :  { %1135 = vadd.xlane.f32.xlu0 %v1025_v58  ;;  %v1026_v34 = vsel %vm2510_vm4, %v1665_v47, 0.0  ;;  %v1667_v23 = vpop.eup %1666  ;;  %vm2951_vm4 = vmmov %vm2878_vm0  ;;  %1686 = vpow2.f32 %v1083_v21 }
 0x321   :  { %1137 = vadd.xlane.f32.xlu1 %v1026_v34  ;;  %v1669_v2 = vpop.eup %1668  ;;  %v1092_v42 = vmul.f32 %v1667_v23, %v1028_v24  ;;  %1688 = vpow2.f32 %v1085_v4  ;;  %v2967_v23 = vld [vmem:[#allocation23_spill] sm:$0xff] }
 0x322   :  { %v1091_v15 = vmul.f32 %v1669_v2, %v1027_v25  ;;  %v1671_v3 = vpop.eup %1670  ;;  %1690 = vpow2.f32 %v1073_v37  ;;  %v2968_v11 = vsub.f32 %v2966_v46, %v2967_v23 }
 0x323   :  { %v1673_v48 = vpop.eup %1672  ;;  %v1099_v16 = vmul.f32 %v1671_v3, %v1035_v38  ;;  %1692 = vpow2.f32 %v1071_v7  ;;  %v1042_v7 = vld [vmem:[#allocation5 + $0x78] sm:$0xff] }
 0x324   :  { %v1675_v0 = vpop.eup %1674  ;;  %v1100_v61 = vmul.f32 %v1673_v48, %v1036_v39  ;;  %v1089_v1 = vmul.f32 1.442695, %v2968_v11  ;;  %v1040_v39 = vld [vmem:[#allocation5 + $0x68] sm:$0xff] }
 0x325   :  { %v1677_v63 = vpop.eup %1676  ;;  %v1093_v58 = vmul.f32 %v1675_v0, %v1029_v33 }
 0x326   :  { %v1679_v34 = vpop.eup %1678  ;;  %v1094_v45 = vmul.f32 %v1677_v63, %v1030_v52  ;;  %v1191_v63 = vld [vmem:[#allocation4] sm:$0xff] }
 0x327   :  { %v1681_v36 = vpop.eup %1680  ;;  %v1101_v24 = vmul.f32 %v1679_v34, %v1037_v18 }
 0x328   :  { %v1683_v2 = vpop.eup %1682  ;;  %v1102_v25 = vmul.f32 %v1681_v36, %v1038_v27 }
 0x390   :  { %v1110_v30 = vpop.xlane.xlu0 %1109 }
 0x391   :  { %v1140_v54 = vadd.f32 %v1110_v30, %v1092_v42  ;;  %v1108_v49 = vpop.xlane.xlu1 %1107  ;;  %v1685_v42 = vpop.eup %1684  ;;  %v1095_v30 = vmul.f32 %v1683_v2, %v1031_v26 }
 0x392   :  { %v1139_v31 = vadd.f32 %v1108_v49, %v1091_v15  ;;  %v1687_v15 = vpop.eup %1686  ;;  %v1096_v3 = vmul.f32 %v1685_v42, %v1032_v60  ;;  %v1039_v49 = vld [vmem:[#allocation5 + $0x60] sm:$0xff] }
 0x393   :  { %1157 = vst.msk [vmem:[#allocation5 + $0x8] sm:$0xff] %vm2951_vm4, %v1140_v54  ;;  %v1689_v38 = vpop.eup %1688  ;;  %v1103_v41 = vmul.f32 %v1687_v15, %v1039_v49  ;;  %vm2981_vm4 = vmmov %vm2878_vm0 }
 0x394   :  { %1156 = vst.msk [vmem:[#allocation5] sm:$0xff] %vm2955_vm7, %v1139_v31  ;;  %v1691_v55 = vpop.eup %1690  ;;  %v1104_v19 = vmul.f32 %v1689_v38, %v1040_v39 }
 0x395   :  { %v1124_v43 = vpop.xlane.xlu0 %1123  ;;  %v1693_v21 = vpop.eup %1692 }
 0x396   :  { %v1126_v59 = vpop.xlane.xlu1 %1125  ;;  %v1147_v17 = vadd.f32 %v1124_v43, %v1099_v16  ;;  %v1097_v9 = vmul.f32 %v1693_v21, %v1033_v50 }
 0x397   :  { %v1148_v47 = vadd.f32 %v1126_v59, %v1100_v61  ;;  %v1034_v61 = vld [vmem:[#allocation5 + $0x38] sm:$0xff] }
 0x398   :  { %1164 = vst.msk [vmem:[#allocation5 + $0x40] sm:$0xff] %vm2878_vm0, %v1147_v17  ;;  %v1098_v37 = vmul.f32 %v1691_v55, %v1034_v61  ;;  %v1041_v17 = vld [vmem:[#allocation5 + $0x70] sm:$0xff] }
 0x399   :  { %1165 = vst.msk [vmem:[#allocation5 + $0x48] sm:$0xff] %vm2962_vm11, %v1148_v47  ;;  %v1112_v62 = vpop.xlane.xlu0 %1111 }
 0x39a   :  { %v1114_v44 = vpop.xlane.xlu1 %1113  ;;  %v1141_v35 = vadd.f32 %v1112_v62, %v1093_v58 }
 0x39b   :  { %v1207_v10 = vld [vmem:[#allocation5] sm:$0xff]  ;;  %v1142_v51 = vadd.f32 %v1114_v44, %v1094_v45 }
 0x39c   :  { %1694 = vlog2.f32 %v1207_v10  ;;  %1158 = vst.msk [vmem:[#allocation5 + $0x10] sm:$0xff] %vm2969_vm3, %v1141_v35 }
 0x39d   :  { %1159 = vst.msk [vmem:[#allocation5 + $0x18] sm:$0xff] %vm2970_vm13, %v1142_v51  ;;  %v1128_v56 = vpop.xlane.xlu0 %1127  ;;  %1696 = vpow2.f32 %v1087_v32 }
 0x39e   :  { %v1130_v13 = vpop.xlane.xlu1 %1129  ;;  %v1149_v14 = vadd.f32 %v1128_v56, %v1101_v24  ;;  %1698 = vpow2.f32 %v1089_v1 }
 0x39f   :  { %v1150_v5 = vadd.f32 %v1130_v13, %v1102_v25 }
 0x3a0   :  { %1166 = vst.msk [vmem:[#allocation5 + $0x50] sm:$0xff] %vm2971_vm1, %v1149_v14 }
 0x3a1   :  { %1167 = vst.msk [vmem:[#allocation5 + $0x58] sm:$0xff] %vm2972_vm5, %v1150_v5  ;;  %v1116_v54 = vpop.xlane.xlu0 %1115 }
 0x3a2   :  { %v1118_v48 = vpop.xlane.xlu1 %1117  ;;  %v1143_v31 = vadd.f32 %v1116_v54, %v1095_v30 }
 0x3a3   :  { %v1144_v12 = vadd.f32 %v1118_v48, %v1096_v3 }
 0x3a4   :  { %1160 = vst.msk [vmem:[#allocation5 + $0x20] sm:$0xff] %vm2973_vm6, %v1143_v31 }
 0x3a5   :  { %1161 = vst.msk [vmem:[#allocation5 + $0x28] sm:$0xff] %vm2974_vm8, %v1144_v12  ;;  %v1132_v20 = vpop.xlane.xlu0 %1131 }
 0x3a6   :  { %v1695_v4 = vpop.eup %1694  ;;  %v1134_v16 = vpop.xlane.xlu1 %1133  ;;  %v1151_v0 = vadd.f32 %v1132_v20, %v1103_v41 }
 0x3a7   :  { %v1224_v43 = vmul.f32 0.6931472, %v1695_v4  ;;  %v1152_v33 = vadd.f32 %v1134_v16, %v1104_v19  ;;  %v1697_v28 = vpop.eup %1696 }
 0x3a8   :  { %1168 = vst.msk [vmem:[#allocation5 + $0x60] sm:$0xff] %vm2975_vm10, %v1151_v0  ;;  %v1699_v52 = vpop.eup %1698  ;;  %v1105_v34 = vmul.f32 %v1697_v28, %v1041_v17 }
 0x3a9   :  { %v1255_v8 = vadd.f32 %v1224_v43, %v1191_v63  ;;  %1169 = vst.msk [vmem:[#allocation5 + $0x68] sm:$0xff] %vm2976_vm14, %v1152_v33  ;;  %v1120_v59 = vpop.xlane.xlu0 %1119  ;;  %v1106_v45 = vmul.f32 %v1699_v52, %v1042_v7 }
 0x3aa   :  { %v1122_v40 = vpop.xlane.xlu1 %1121  ;;  %v1145_v6 = vadd.f32 %v1120_v59, %v1097_v9 }
 0x3ab   :  { %v1287_v47 = vsub.f32 %v1255_v8, %v1271_v29  ;;  %v1146_v58 = vadd.f32 %v1122_v40, %v1098_v37 }
 0x3ac   :  { %1162 = vst.msk [vmem:[#allocation5 + $0x30] sm:$0xff] %vm2977_vm12, %v1145_v6 }
 0x3ad   :  { %1370 = vst.msk [vmem:[%s2810_s5] sm:$0xff] %vm2978_vm9, %v1287_v47  ;;  %v1136_v62 = vpop.xlane.xlu0 %1135 }
 0x3ae   :  { %1163 = vst.msk [vmem:[#allocation5 + $0x38] sm:$0xff] %vm2979_vm15, %v1146_v58  ;;  %v1138_v18 = vpop.xlane.xlu1 %1137  ;;  %v1153_v36 = vadd.f32 %v1136_v62, %v1105_v34 }
 0x3af   :  { %v1154_v44 = vadd.f32 %v1138_v18, %v1106_v45 }
 0x3b0   :  { %1170 = vst.msk [vmem:[#allocation5 + $0x70] sm:$0xff] %vm2980_vm2, %v1153_v36 }
 0x3b1   :  { %1171 = vst.msk [vmem:[#allocation5 + $0x78] sm:$0xff] %vm2981_vm4, %v1154_v44 }
 0x3b2   :  { %1390 = vsyncpa [#allocation7], 1 }
 0x3b3   :  { %1391 = vsyncpa [#allocation9], 1 }

</bundles_post_ra>
